<compile_context>
chip_gen: v5e
topology: v5e:2x2
jax: 0.10.0
libtpu: 0.0.40
codegen_flags: <defaults>
</compile_context>

<pallas_src>
import math

import jax
import jax.numpy as jnp
from jax.experimental import pallas as pl
from jax.experimental.pallas import tpu as pltpu

# ----------------------- small ModelArgs-consistent config -----------------------
DIM = 96
DIMP = 128                              # lane-padded residual width
N_LAYERS = 2
N_HEADS = 6
N_KV_HEADS = 3
VOCAB = 128
MULTIPLE_OF = 256
NORM_EPS = 1e-5
MAX_SEQ_LEN = 32

HEAD_DIM = DIM // N_HEADS               # 16
N_REP = N_HEADS // N_KV_HEADS           # 2
DQ = N_HEADS * HEAD_DIM                 # 96
DKV = N_KV_HEADS * HEAD_DIM             # 48
DQP = 128                               # lane-padded section width of fused QKV

# FeedForward hidden sizing exactly as in the reference __init__
_hidden_dim = int(2 * (4 * DIM) / 3)                                       # 256 (w1 / w2)
_hidden3 = MULTIPLE_OF * ((_hidden_dim + MULTIPLE_OF - 1) // MULTIPLE_OF)  # 256 (w3)
assert _hidden_dim == _hidden3, "choose DIM/MULTIPLE_OF so the reference FFN is consistent"
HIDDEN = _hidden_dim


# ----------------------------------- kernel -----------------------------------
def _rmsnorm(x, w):
    # Pads (lanes DIM..DIMP-1) are zero, so summing 128 lanes == summing 96 lanes;
    # divide by the true DIM.
    ss = jnp.sum(x * x, axis=-1, keepdims=True) * (1.0 / DIM)
    return (x * jax.lax.rsqrt(ss + NORM_EPS)) * w


def transformer_kernel(start_pos_ref,                 # SMEM i32 (1,)
                       h0_ref,                        # (BP, DIMP) f32
                       cos_ref,                       # (1, DQP) f32
                       sin_ref,                       # (1, DQP) f32 (sign folded in)
                       attn_nw_ref,                   # (L, 1, DIMP) f32
                       wqkv_ref,                      # (L, DIMP, 3*DQP) bf16 (repeat_kv folded)
                       wo_ref,                        # (L, DQP, DIMP) bf16 (zero-padded)
                       ffn_nw_ref,                    # (L, 1, DIMP) f32
                       w13_ref,                       # (L, DIMP, 2*HIDDEN) bf16
                       w2_ref,                        # (L, HIDDEN, DIMP) bf16
                       headsum_ref,                   # (DQP, DQP) bf16 (seg@segT * 1/sqrt(hd))
                       swap_ref,                      # (DQP, DQP) f32 pair-swap permutation
                       final_nw_ref,                  # (1, DIMP) f32
                       wout_ref,                      # (DIMP, VOCAB) bf16
                       logits_ref):                   # (BP, VOCAB) f32
    sp = start_pos_ref[0].astype(jnp.float32)         # runtime scalar
    cos_v = cos_ref[...]
    sin_v = sin_ref[...]
    swap_m = swap_ref[...]

    x = h0_ref[...]                                   # (BP, DIMP) f32 residual stream

    def rotary(t):
        # interleaved-pair rotation: out[2i] = t0*c - t1*s ; out[2i+1] = t1*c + t0*s
        t_sw = jnp.dot(t, swap_m, preferred_element_type=jnp.float32)
        return t * cos_v + t_sw * sin_v

    for l in range(N_LAYERS):                         # fully unrolled (tiny model)
        # ---------------- attention sub-block ----------------
        xn = _rmsnorm(x, attn_nw_ref[l])
        qkv = jnp.dot(xn.astype(jnp.bfloat16), wqkv_ref[l],
                      preferred_element_type=jnp.float32)           # (BP, 3*DQP)
        q = rotary(qkv[:, 0:DQP])                     # rotary on q (as in reference)
        k = qkv[:, DQP:2 * DQP]                       # no rotary on k (as in reference)
        v = rotary(qkv[:, 2 * DQP:3 * DQP])           # rotary on v (as in reference)

        # per-head score of the new position; 1/sqrt(head_dim) folded into headsum
        s = jnp.dot((q * k).astype(jnp.bfloat16), headsum_ref[...],
                    preferred_element_type=jnp.float32)             # (BP, DQP)

        # zero-cache softmax with ONE exp:  m = max(s,0)
        #   s>=0: exp(s-m)=1,        exp(-m)=exp(-s)=exp(-|s|)
        #   s< 0: exp(s-m)=exp(-|s|), exp(-m)=1
        et = jnp.exp(-jnp.abs(s))
        e = jnp.where(s >= 0.0, 1.0, et)
        em = jnp.where(s >= 0.0, et, 1.0)
        z = sp * em + e
        p = e * pl.reciprocal(z, approx=True)                       # (BP, DQP)

        attn = (p * v).astype(jnp.bfloat16)                         # pads are 0
        h1 = x + jnp.dot(attn, wo_ref[l],
                         preferred_element_type=jnp.float32)        # (BP, DIMP)

        # ---------------- feed-forward sub-block (SwiGLU) ----------------
        hn = _rmsnorm(h1, ffn_nw_ref[l])
        a13 = jnp.dot(hn.astype(jnp.bfloat16), w13_ref[l],
                      preferred_element_type=jnp.float32)           # (BP, 2*HIDDEN)
        a1 = a13[:, :HIDDEN]
        a3 = a13[:, HIDDEN:]
        swish = a1 * pl.reciprocal(1.0 + jnp.exp(-a1), approx=True)  # silu
        x = h1 + jnp.dot((swish * a3).astype(jnp.bfloat16), w2_ref[l],
                         preferred_element_type=jnp.float32)         # (BP, DIMP)

    # final RMSNorm + output projection (lane-dense (BP,128) store)
    hn_f = _rmsnorm(x, final_nw_ref[...])
    logits_ref[...] = jnp.dot(hn_f.astype(jnp.bfloat16), wout_ref[...],
                              preferred_element_type=jnp.float32)


# ------------------- one-time, position-invariant weight prep -------------------
def prepare_weights(params):
    """Build all start_pos-independent kernel operands ONCE; reuse every step."""
    def pad_last(a, to):
        return jnp.pad(a, [(0, 0)] * (a.ndim - 1) + [(0, to - a.shape[-1])])

    def pad_axis(a, to, axis):
        pads = [(0, 0)] * a.ndim
        pads[axis] = (0, to - a.shape[axis])
        return jnp.pad(a, pads)

    # repeat_kv replication matrix (static 0/1): column j of (k @ rep) = k[:, src(j)]
    kv_of_q = (jnp.arange(DQ) // HEAD_DIM) // N_REP
    src_lane = kv_of_q * HEAD_DIM + (jnp.arange(DQ) % HEAD_DIM)
    rep = (jnp.arange(DKV)[:, None] == src_lane[None, :]).astype(jnp.float32)   # (DKV, DQ)

    wq = params["wq"]                                  # (L, DIM, DQ)
    wk_eff = params["wk"] @ rep                        # (L, DIM, DQ)
    wv_eff = params["wv"] @ rep                        # (L, DIM, DQ)

    wqkv = jnp.concatenate(
        [pad_last(wq, DQP), pad_last(wk_eff, DQP), pad_last(wv_eff, DQP)], axis=-1)
    wqkv = pad_axis(wqkv, DIMP, 1).astype(jnp.bfloat16)              # (L, 128, 384)

    wo = pad_axis(pad_last(params["wo"], DIMP), DQP, 1).astype(jnp.bfloat16)   # (L, 128, 128)

    w13 = jnp.concatenate([params["w1"], params["w3"]], axis=-1)     # (L, DIM, 512)
    w13 = pad_axis(w13, DIMP, 1).astype(jnp.bfloat16)                # (L, 128, 512)
    w2 = pad_last(params["w2"], DIMP).astype(jnp.bfloat16)           # (L, 256, 128)
    wout = pad_axis(params["wout"], DIMP, 0).astype(jnp.bfloat16)    # (128, 128)

    attn_nw = pad_last(params["attn_norm"], DIMP)                    # (L, 1, 128) f32
    ffn_nw = pad_last(params["ffn_norm"], DIMP)                      # (L, 1, 128) f32
    final_nw = pad_last(params["final_norm"], DIMP)                  # (1, 128) f32
    tok_emb = pad_last(params["tok_emb"], DIMP)                      # (VOCAB, 128) f32

    # per-head segment-sum-and-broadcast matrix with 1/sqrt(head_dim) folded in
    head_id = jnp.arange(DQP) // HEAD_DIM
    valid = jnp.arange(DQP) < DQ
    headsum = ((head_id[:, None] == head_id[None, :]) & valid[:, None] & valid[None, :])
    headsum = (headsum.astype(jnp.float32) * (1.0 / math.sqrt(HEAD_DIM))).astype(jnp.bfloat16)

    # adjacent-lane pair-swap permutation for rotary: (x @ swap)[:, j] = x[:, j ^ 1]
    idx = jnp.arange(DQP)
    swap = (idx[:, None] == (idx[None, :] ^ 1)).astype(jnp.float32)  # (128, 128)

    return {
        "tok_emb": tok_emb, "attn_nw": attn_nw, "ffn_nw": ffn_nw, "final_nw": final_nw,
        "wqkv": wqkv, "wo": wo, "w13": w13, "w2": w2, "wout": wout,
        "headsum": headsum, "swap": swap,
    }


# ----------------------------------- wrapper -----------------------------------
def transformer_forward(tokens, start_pos, prepped):
    """tokens: (B, 1) int32; start_pos: runtime int scalar (traced under jit);
    prepped: output of prepare_weights (built once, outside the per-token path)."""
    B, seq_len = tokens.shape
    assert seq_len == 1, "Only one token at a time can be processed"
    BP = max(8, ((B + 7) // 8) * 8)                    # sublane-pad batch to full tiles

    h0 = prepped["tok_emb"][tokens[:, 0]]              # (B, 128) f32, pads already zero
    h0 = jnp.pad(h0, ((0, BP - B), (0, 0)))

    # rotary cos / signed-sin lane vectors at position start_pos (tiny per-step work)
    sp_f = jnp.asarray(start_pos, jnp.float32)
    i = jnp.arange(0, HEAD_DIM, 2, dtype=jnp.float32)
    theta = 1.0 / (10000.0 ** (i / HEAD_DIM))
    ang = sp_f * theta
    c, s = jnp.cos(ang), jnp.sin(ang)
    cos_h = jnp.repeat(c, 2)                           # (16,)  [c0,c0,c1,c1,...]
    sin_h = jnp.stack([-s, s], axis=-1).reshape(-1)    # (16,)  [-s0,s0,-s1,s1,...]
    cos_v = jnp.tile(cos_h, DQP // HEAD_DIM).reshape(1, DQP)
    sin_v = jnp.tile(sin_h, DQP // HEAD_DIM).reshape(1, DQP)

    start_arr = jnp.asarray(start_pos, jnp.int32).reshape(1)

    vmem = pl.BlockSpec(memory_space=pltpu.MemorySpace.VMEM)
    smem = pl.BlockSpec(memory_space=pltpu.MemorySpace.SMEM)

    logits = pl.pallas_call(
        transformer_kernel,
        out_shape=jax.ShapeDtypeStruct((BP, VOCAB), jnp.float32),
        in_specs=[smem] + [vmem] * 13,
        out_specs=vmem,
    )(start_arr, h0, cos_v, sin_v,
      prepped["attn_nw"], prepped["wqkv"], prepped["wo"],
      prepped["ffn_nw"], prepped["w13"], prepped["w2"],
      prepped["headsum"], prepped["swap"], prepped["final_nw"], prepped["wout"])

    return logits[:B].reshape(B, 1, VOCAB)


# ------------------------- pure-JAX reference (for checking) -------------------------
def reference_forward(tokens, start_pos, params):
    B, _ = tokens.shape
    h = params["tok_emb"][tokens[:, 0]][:, None, :].astype(jnp.float32)    # (B,1,DIM)

    i = jnp.arange(0, HEAD_DIM, 2, dtype=jnp.float32)
    theta = 1.0 / (10000.0 ** (i / HEAD_DIM))
    ang = start_pos * theta
    fc = jnp.cos(ang) + 1j * jnp.sin(ang)

    def rmsnorm(x, w):
        ms = jnp.mean(x * x, axis=-1, keepdims=True)
        return (x * jax.lax.rsqrt(ms + NORM_EPS)) * w

    def rotary(x):  # (B,1,H,hd)
        xr = x.reshape(*x.shape[:-1], HEAD_DIM // 2, 2)
        xc = xr[..., 0] + 1j * xr[..., 1]
        out = xc * fc[None, None, None, :]
        return jnp.stack([out.real, out.imag], axis=-1).reshape(x.shape)

    for l in range(N_LAYERS):
        x = h
        xn = rmsnorm(x, params["attn_norm"][l, 0])
        xq = (xn @ params["wq"][l]).reshape(B, 1, N_HEADS, HEAD_DIM)
        xk = (xn @ params["wk"][l]).reshape(B, 1, N_KV_HEADS, HEAD_DIM)
        xv = (xn @ params["wv"][l]).reshape(B, 1, N_KV_HEADS, HEAD_DIM)
        xq = rotary(xq)
        xv = rotary(xv)                                   # matches the reference code
        T = start_pos + 1
        keys = jnp.zeros((B, T, N_KV_HEADS, HEAD_DIM), jnp.float32).at[:, start_pos].set(xk[:, 0])
        vals = jnp.zeros((B, T, N_KV_HEADS, HEAD_DIM), jnp.float32).at[:, start_pos].set(xv[:, 0])
        keys = jnp.repeat(keys, N_REP, axis=2)
        vals = jnp.repeat(vals, N_REP, axis=2)
        xqT = jnp.transpose(xq, (0, 2, 1, 3))
        kT = jnp.transpose(keys, (0, 2, 3, 1)) / math.sqrt(HEAD_DIM)
        vT = jnp.transpose(vals, (0, 2, 1, 3))
        scores = jax.nn.softmax(jnp.einsum('bhqd,bhdt->bhqt', xqT, kT), axis=-1)
        out = jnp.einsum('bhqt,bhtd->bhqd', scores, vT)
        out = jnp.transpose(out, (0, 2, 1, 3)).reshape(B, 1, DQ)
        h1 = x + out @ params["wo"][l]
        hn = rmsnorm(h1, params["ffn_norm"][l, 0])
        swish = jax.nn.silu(hn @ params["w1"][l])
        h = h1 + (swish * (hn @ params["w3"][l])) @ params["w2"][l]

    h = rmsnorm(h, params["final_norm"][0])
    return h @ params["wout"]


# ----------------------------------- main -----------------------------------
def _init_params(key):
    ks = jax.random.split(key, 12)
    scale = 0.05
    params = {
        "tok_emb":   jax.random.normal(ks[0], (VOCAB, DIM), jnp.float32),
        "attn_norm": jnp.ones((N_LAYERS, 1, DIM), jnp.float32),
        "ffn_norm":  jnp.ones((N_LAYERS, 1, DIM), jnp.float32),
        "final_norm": jnp.ones((1, DIM), jnp.float32),
        "wq": scale * jax.random.normal(ks[1], (N_LAYERS, DIM, DQ), jnp.float32),
        "wk": scale * jax.random.normal(ks[2], (N_LAYERS, DIM, DKV), jnp.float32),
        "wv": scale * jax.random.normal(ks[3], (N_LAYERS, DIM, DKV), jnp.float32),
        "wo": scale * jax.random.normal(ks[4], (N_LAYERS, DQ, DIM), jnp.float32),
        "w1": scale * jax.random.normal(ks[5], (N_LAYERS, DIM, HIDDEN), jnp.float32),
        "w2": scale * jax.random.normal(ks[6], (N_LAYERS, HIDDEN, DIM), jnp.float32),
        "w3": scale * jax.random.normal(ks[7], (N_LAYERS, DIM, HIDDEN), jnp.float32),
        "wout": scale * jax.random.normal(ks[8], (DIM, VOCAB), jnp.float32),
    }
    return params


if __name__ == "__main__":
    key = jax.random.PRNGKey(0)
    params = _init_params(key)

    # Position-invariant weight preparation: done ONCE, outside the decode loop.
    prepped = jax.block_until_ready(prepare_weights(params))

    B = 2
    start_pos = 3  # must be < MAX_SEQ_LEN; exercises the zero-filled cache path
    tokens = jax.random.randint(jax.random.PRNGKey(1), (B, 1), 0, VOCAB, dtype=jnp.int32)

    # start_pos is a *dynamic* argument: the same compiled kernel serves every
    # decode position (no per-token recompiles and no per-token weight rebuilds).
    fwd = jax.jit(transformer_forward)
    logits = fwd(tokens, jnp.int32(start_pos), prepped)
    logits = jax.block_until_ready(logits)

    ref = jax.block_until_ready(reference_forward(tokens, start_pos, params))
    max_err = float(jnp.max(jnp.abs(logits - ref)))
    assert logits.shape == (B, 1, VOCAB) and logits.dtype == jnp.float32
    assert max_err < 5e-2, f"mismatch vs reference: {max_err}"

    print("KERNEL_OK")
</pallas_src>

<mosaic_0001>
module attributes {stable_mosaic.version = 11 : i64} {
  func.func @transformer_kernel(%arg0: memref<1xi32, #tpu.memory_space<smem>>, %arg1: memref<8x128xf32, #tpu.memory_space<vmem>>, %arg2: memref<1x128xf32, #tpu.memory_space<vmem>>, %arg3: memref<1x128xf32, #tpu.memory_space<vmem>>, %arg4: memref<2x1x128xf32, #tpu.memory_space<vmem>>, %arg5: memref<2x128x384xbf16, #tpu.memory_space<vmem>>, %arg6: memref<2x128x128xbf16, #tpu.memory_space<vmem>>, %arg7: memref<2x1x128xf32, #tpu.memory_space<vmem>>, %arg8: memref<2x128x512xbf16, #tpu.memory_space<vmem>>, %arg9: memref<2x256x128xbf16, #tpu.memory_space<vmem>>, %arg10: memref<128x128xbf16, #tpu.memory_space<vmem>>, %arg11: memref<128x128xf32, #tpu.memory_space<vmem>>, %arg12: memref<1x128xf32, #tpu.memory_space<vmem>>, %arg13: memref<128x128xbf16, #tpu.memory_space<vmem>>, %arg14: memref<8x128xf32, #tpu.memory_space<vmem>>) attributes {dimension_semantics = [], scalar_prefetch = 0 : i64, scratch_operands = 0 : i64, tpu.core_type = #tpu.core_type<tc>} {
    %c0 = arith.constant 0 : index
    %0 = memref.load %arg0[%c0] : memref<1xi32, #tpu.memory_space<smem>>
    %1 = arith.sitofp %0 : i32 to f32
    %c0_0 = arith.constant 0 : index
    %c0_1 = arith.constant 0 : index
    %2 = vector.load %arg2[%c0_0, %c0_1] : memref<1x128xf32, #tpu.memory_space<vmem>>, vector<1x128xf32>
    %c0_2 = arith.constant 0 : index
    %c0_3 = arith.constant 0 : index
    %3 = vector.load %arg3[%c0_2, %c0_3] : memref<1x128xf32, #tpu.memory_space<vmem>>, vector<1x128xf32>
    %c0_4 = arith.constant 0 : index
    %c0_5 = arith.constant 0 : index
    %4 = vector.load %arg11[%c0_4, %c0_5] : memref<128x128xf32, #tpu.memory_space<vmem>>, vector<128x128xf32>
    %c0_6 = arith.constant 0 : index
    %c0_7 = arith.constant 0 : index
    %5 = vector.load %arg1[%c0_6, %c0_7] : memref<8x128xf32, #tpu.memory_space<vmem>>, vector<8x128xf32>
    %c0_8 = arith.constant 0 : index
    %c0_9 = arith.constant 0 : index
    %c0_10 = arith.constant 0 : index
    %6 = vector.load %arg4[%c0_8, %c0_9, %c0_10] : memref<2x1x128xf32, #tpu.memory_space<vmem>>, vector<1x1x128xf32>
    %7 = vector.shape_cast %6 : vector<1x1x128xf32> to vector<1x128xf32>
    %8 = arith.mulf %5, %5 : vector<8x128xf32>
    %cst = arith.constant dense<0.000000e+00> : vector<8xf32>
    %9 = vector.multi_reduction <add>, %8, %cst [1] : vector<8x128xf32> to vector<8xf32>
    %10 = vector.shape_cast %9 : vector<8xf32> to vector<8x1xf32>
    %cst_11 = arith.constant 0.010416667 : f32
    %11 = vector.broadcast %cst_11 : f32 to vector<8x1xf32>
    %12 = arith.mulf %10, %11 : vector<8x1xf32>
    %cst_12 = arith.constant 9.99999974E-6 : f32
    %13 = vector.broadcast %cst_12 : f32 to vector<8x1xf32>
    %14 = arith.addf %12, %13 : vector<8x1xf32>
    %15 = math.rsqrt %14 : vector<8x1xf32>
    %16 = vector.broadcast %15 : vector<8x1xf32> to vector<8x128xf32>
    %17 = arith.mulf %5, %16 : vector<8x128xf32>
    %18 = vector.broadcast %7 : vector<1x128xf32> to vector<8x128xf32>
    %19 = arith.mulf %17, %18 : vector<8x128xf32>
    %20 = arith.truncf %19 : vector<8x128xf32> to vector<8x128xbf16>
    %c0_13 = arith.constant 0 : index
    %c0_14 = arith.constant 0 : index
    %c0_15 = arith.constant 0 : index
    %21 = vector.load %arg5[%c0_13, %c0_14, %c0_15] : memref<2x128x384xbf16, #tpu.memory_space<vmem>>, vector<1x128x384xbf16>
    %22 = vector.shape_cast %21 : vector<1x128x384xbf16> to vector<128x384xbf16>
    %cst_16 = arith.constant dense<0.000000e+00> : vector<8x384xf32>
    %23 = tpu.matmul %20, %22, %cst_16 {dimension_numbers = #tpu.dot_dimension_numbers<[1], [0], [0], [1], [0, 0, 1, 1], [], []>} : vector<8x128xbf16>, vector<128x384xbf16>, vector<8x384xf32> -> vector<8x384xf32>
    %24 = vector.extract_strided_slice %23 {offsets = [0, 0], sizes = [8, 128], strides = [1, 1]} : vector<8x384xf32> to vector<8x128xf32>
    %cst_17 = arith.constant dense<0.000000e+00> : vector<8x128xf32>
    %25 = tpu.matmul %24, %4, %cst_17 {dimension_numbers = #tpu.dot_dimension_numbers<[1], [0], [0], [1], [0, 0, 1, 1], [], []>} : vector<8x128xf32>, vector<128x128xf32>, vector<8x128xf32> -> vector<8x128xf32>
    %26 = vector.broadcast %2 : vector<1x128xf32> to vector<8x128xf32>
    %27 = arith.mulf %24, %26 : vector<8x128xf32>
    %28 = vector.broadcast %3 : vector<1x128xf32> to vector<8x128xf32>
    %29 = arith.mulf %25, %28 : vector<8x128xf32>
    %30 = arith.addf %27, %29 : vector<8x128xf32>
    %31 = vector.extract_strided_slice %23 {offsets = [0, 128], sizes = [8, 128], strides = [1, 1]} : vector<8x384xf32> to vector<8x128xf32>
    %32 = vector.extract_strided_slice %23 {offsets = [0, 256], sizes = [8, 128], strides = [1, 1]} : vector<8x384xf32> to vector<8x128xf32>
    %cst_18 = arith.constant dense<0.000000e+00> : vector<8x128xf32>
    %33 = tpu.matmul %32, %4, %cst_18 {dimension_numbers = #tpu.dot_dimension_numbers<[1], [0], [0], [1], [0, 0, 1, 1], [], []>} : vector<8x128xf32>, vector<128x128xf32>, vector<8x128xf32> -> vector<8x128xf32>
    %34 = vector.broadcast %2 : vector<1x128xf32> to vector<8x128xf32>
    %35 = arith.mulf %32, %34 : vector<8x128xf32>
    %36 = vector.broadcast %3 : vector<1x128xf32> to vector<8x128xf32>
    %37 = arith.mulf %33, %36 : vector<8x128xf32>
    %38 = arith.addf %35, %37 : vector<8x128xf32>
    %39 = arith.mulf %30, %31 : vector<8x128xf32>
    %40 = arith.truncf %39 : vector<8x128xf32> to vector<8x128xbf16>
    %c0_19 = arith.constant 0 : index
    %c0_20 = arith.constant 0 : index
    %41 = vector.load %arg10[%c0_19, %c0_20] : memref<128x128xbf16, #tpu.memory_space<vmem>>, vector<128x128xbf16>
    %cst_21 = arith.constant dense<0.000000e+00> : vector<8x128xf32>
    %42 = tpu.matmul %40, %41, %cst_21 {dimension_numbers = #tpu.dot_dimension_numbers<[1], [0], [0], [1], [0, 0, 1, 1], [], []>} : vector<8x128xbf16>, vector<128x128xbf16>, vector<8x128xf32> -> vector<8x128xf32>
    %43 = math.absf %42 : vector<8x128xf32>
    %cst_22 = arith.constant 0.000000e+00 : f32
    %44 = vector.broadcast %cst_22 : f32 to vector<8x128xf32>
    %45 = arith.subf %44, %43 : vector<8x128xf32>
    %46 = math.exp %45 : vector<8x128xf32>
    %cst_23 = arith.constant 0.000000e+00 : f32
    %47 = vector.broadcast %cst_23 : f32 to vector<8x128xf32>
    %48 = arith.cmpf oge, %42, %47 : vector<8x128xf32>
    %cst_24 = arith.constant 1.000000e+00 : f32
    %49 = vector.broadcast %cst_24 : f32 to vector<8x128xf32>
    %50 = arith.select %48, %49, %46 : vector<8x128xi1>, vector<8x128xf32>
    %cst_25 = arith.constant 0.000000e+00 : f32
    %51 = vector.broadcast %cst_25 : f32 to vector<8x128xf32>
    %52 = arith.cmpf oge, %42, %51 : vector<8x128xf32>
    %cst_26 = arith.constant 1.000000e+00 : f32
    %53 = vector.broadcast %cst_26 : f32 to vector<8x128xf32>
    %54 = arith.select %52, %46, %53 : vector<8x128xi1>, vector<8x128xf32>
    %55 = vector.broadcast %1 : f32 to vector<8x128xf32>
    %56 = arith.mulf %55, %54 : vector<8x128xf32>
    %57 = arith.addf %56, %50 : vector<8x128xf32>
    %58 = tpu.reciprocal %57 {approx = true} : vector<8x128xf32> -> vector<8x128xf32>
    %59 = arith.mulf %50, %58 : vector<8x128xf32>
    %60 = arith.mulf %59, %38 : vector<8x128xf32>
    %61 = arith.truncf %60 : vector<8x128xf32> to vector<8x128xbf16>
    %c0_27 = arith.constant 0 : index
    %c0_28 = arith.constant 0 : index
    %c0_29 = arith.constant 0 : index
    %62 = vector.load %arg6[%c0_27, %c0_28, %c0_29] : memref<2x128x128xbf16, #tpu.memory_space<vmem>>, vector<1x128x128xbf16>
    %63 = vector.shape_cast %62 : vector<1x128x128xbf16> to vector<128x128xbf16>
    %cst_30 = arith.constant dense<0.000000e+00> : vector<8x128xf32>
    %64 = tpu.matmul %61, %63, %cst_30 {dimension_numbers = #tpu.dot_dimension_numbers<[1], [0], [0], [1], [0, 0, 1, 1], [], []>} : vector<8x128xbf16>, vector<128x128xbf16>, vector<8x128xf32> -> vector<8x128xf32>
    %65 = arith.addf %5, %64 : vector<8x128xf32>
    %c0_31 = arith.constant 0 : index
    %c0_32 = arith.constant 0 : index
    %c0_33 = arith.constant 0 : index
    %66 = vector.load %arg7[%c0_31, %c0_32, %c0_33] : memref<2x1x128xf32, #tpu.memory_space<vmem>>, vector<1x1x128xf32>
    %67 = vector.shape_cast %66 : vector<1x1x128xf32> to vector<1x128xf32>
    %68 = arith.mulf %65, %65 : vector<8x128xf32>
    %cst_34 = arith.constant dense<0.000000e+00> : vector<8xf32>
    %69 = vector.multi_reduction <add>, %68, %cst_34 [1] : vector<8x128xf32> to vector<8xf32>
    %70 = vector.shape_cast %69 : vector<8xf32> to vector<8x1xf32>
    %cst_35 = arith.constant 0.010416667 : f32
    %71 = vector.broadcast %cst_35 : f32 to vector<8x1xf32>
    %72 = arith.mulf %70, %71 : vector<8x1xf32>
    %cst_36 = arith.constant 9.99999974E-6 : f32
    %73 = vector.broadcast %cst_36 : f32 to vector<8x1xf32>
    %74 = arith.addf %72, %73 : vector<8x1xf32>
    %75 = math.rsqrt %74 : vector<8x1xf32>
    %76 = vector.broadcast %75 : vector<8x1xf32> to vector<8x128xf32>
    %77 = arith.mulf %65, %76 : vector<8x128xf32>
    %78 = vector.broadcast %67 : vector<1x128xf32> to vector<8x128xf32>
    %79 = arith.mulf %77, %78 : vector<8x128xf32>
    %80 = arith.truncf %79 : vector<8x128xf32> to vector<8x128xbf16>
    %c0_37 = arith.constant 0 : index
    %c0_38 = arith.constant 0 : index
    %c0_39 = arith.constant 0 : index
    %81 = vector.load %arg8[%c0_37, %c0_38, %c0_39] : memref<2x128x512xbf16, #tpu.memory_space<vmem>>, vector<1x128x512xbf16>
    %82 = vector.shape_cast %81 : vector<1x128x512xbf16> to vector<128x512xbf16>
    %cst_40 = arith.constant dense<0.000000e+00> : vector<8x512xf32>
    %83 = tpu.matmul %80, %82, %cst_40 {dimension_numbers = #tpu.dot_dimension_numbers<[1], [0], [0], [1], [0, 0, 1, 1], [], []>} : vector<8x128xbf16>, vector<128x512xbf16>, vector<8x512xf32> -> vector<8x512xf32>
    %84 = vector.extract_strided_slice %83 {offsets = [0, 0], sizes = [8, 256], strides = [1, 1]} : vector<8x512xf32> to vector<8x256xf32>
    %85 = vector.extract_strided_slice %83 {offsets = [0, 256], sizes = [8, 256], strides = [1, 1]} : vector<8x512xf32> to vector<8x256xf32>
    %cst_41 = arith.constant 0.000000e+00 : f32
    %86 = vector.broadcast %cst_41 : f32 to vector<8x256xf32>
    %87 = arith.subf %86, %84 : vector<8x256xf32>
    %88 = math.exp %87 : vector<8x256xf32>
    %cst_42 = arith.constant 1.000000e+00 : f32
    %89 = vector.broadcast %cst_42 : f32 to vector<8x256xf32>
    %90 = arith.addf %89, %88 : vector<8x256xf32>
    %91 = tpu.reciprocal %90 {approx = true} : vector<8x256xf32> -> vector<8x256xf32>
    %92 = arith.mulf %84, %91 : vector<8x256xf32>
    %93 = arith.mulf %92, %85 : vector<8x256xf32>
    %94 = arith.truncf %93 : vector<8x256xf32> to vector<8x256xbf16>
    %c0_43 = arith.constant 0 : index
    %c0_44 = arith.constant 0 : index
    %c0_45 = arith.constant 0 : index
    %95 = vector.load %arg9[%c0_43, %c0_44, %c0_45] : memref<2x256x128xbf16, #tpu.memory_space<vmem>>, vector<1x256x128xbf16>
    %96 = vector.shape_cast %95 : vector<1x256x128xbf16> to vector<256x128xbf16>
    %cst_46 = arith.constant dense<0.000000e+00> : vector<8x128xf32>
    %97 = tpu.matmul %94, %96, %cst_46 {dimension_numbers = #tpu.dot_dimension_numbers<[1], [0], [0], [1], [0, 0, 1, 1], [], []>} : vector<8x256xbf16>, vector<256x128xbf16>, vector<8x128xf32> -> vector<8x128xf32>
    %98 = arith.addf %65, %97 : vector<8x128xf32>
    %c1 = arith.constant 1 : index
    %c0_47 = arith.constant 0 : index
    %c0_48 = arith.constant 0 : index
    %99 = vector.load %arg4[%c1, %c0_47, %c0_48] : memref<2x1x128xf32, #tpu.memory_space<vmem>>, vector<1x1x128xf32>
    %100 = vector.shape_cast %99 : vector<1x1x128xf32> to vector<1x128xf32>
    %101 = arith.mulf %98, %98 : vector<8x128xf32>
    %cst_49 = arith.constant dense<0.000000e+00> : vector<8xf32>
    %102 = vector.multi_reduction <add>, %101, %cst_49 [1] : vector<8x128xf32> to vector<8xf32>
    %103 = vector.shape_cast %102 : vector<8xf32> to vector<8x1xf32>
    %cst_50 = arith.constant 0.010416667 : f32
    %104 = vector.broadcast %cst_50 : f32 to vector<8x1xf32>
    %105 = arith.mulf %103, %104 : vector<8x1xf32>
    %cst_51 = arith.constant 9.99999974E-6 : f32
    %106 = vector.broadcast %cst_51 : f32 to vector<8x1xf32>
    %107 = arith.addf %105, %106 : vector<8x1xf32>
    %108 = math.rsqrt %107 : vector<8x1xf32>
    %109 = vector.broadcast %108 : vector<8x1xf32> to vector<8x128xf32>
    %110 = arith.mulf %98, %109 : vector<8x128xf32>
    %111 = vector.broadcast %100 : vector<1x128xf32> to vector<8x128xf32>
    %112 = arith.mulf %110, %111 : vector<8x128xf32>
    %113 = arith.truncf %112 : vector<8x128xf32> to vector<8x128xbf16>
    %c1_52 = arith.constant 1 : index
    %c0_53 = arith.constant 0 : index
    %c0_54 = arith.constant 0 : index
    %114 = vector.load %arg5[%c1_52, %c0_53, %c0_54] : memref<2x128x384xbf16, #tpu.memory_space<vmem>>, vector<1x128x384xbf16>
    %115 = vector.shape_cast %114 : vector<1x128x384xbf16> to vector<128x384xbf16>
    %cst_55 = arith.constant dense<0.000000e+00> : vector<8x384xf32>
    %116 = tpu.matmul %113, %115, %cst_55 {dimension_numbers = #tpu.dot_dimension_numbers<[1], [0], [0], [1], [0, 0, 1, 1], [], []>} : vector<8x128xbf16>, vector<128x384xbf16>, vector<8x384xf32> -> vector<8x384xf32>
    %117 = vector.extract_strided_slice %116 {offsets = [0, 0], sizes = [8, 128], strides = [1, 1]} : vector<8x384xf32> to vector<8x128xf32>
    %cst_56 = arith.constant dense<0.000000e+00> : vector<8x128xf32>
    %118 = tpu.matmul %117, %4, %cst_56 {dimension_numbers = #tpu.dot_dimension_numbers<[1], [0], [0], [1], [0, 0, 1, 1], [], []>} : vector<8x128xf32>, vector<128x128xf32>, vector<8x128xf32> -> vector<8x128xf32>
    %119 = vector.broadcast %2 : vector<1x128xf32> to vector<8x128xf32>
    %120 = arith.mulf %117, %119 : vector<8x128xf32>
    %121 = vector.broadcast %3 : vector<1x128xf32> to vector<8x128xf32>
    %122 = arith.mulf %118, %121 : vector<8x128xf32>
    %123 = arith.addf %120, %122 : vector<8x128xf32>
    %124 = vector.extract_strided_slice %116 {offsets = [0, 128], sizes = [8, 128], strides = [1, 1]} : vector<8x384xf32> to vector<8x128xf32>
    %125 = vector.extract_strided_slice %116 {offsets = [0, 256], sizes = [8, 128], strides = [1, 1]} : vector<8x384xf32> to vector<8x128xf32>
    %cst_57 = arith.constant dense<0.000000e+00> : vector<8x128xf32>
    %126 = tpu.matmul %125, %4, %cst_57 {dimension_numbers = #tpu.dot_dimension_numbers<[1], [0], [0], [1], [0, 0, 1, 1], [], []>} : vector<8x128xf32>, vector<128x128xf32>, vector<8x128xf32> -> vector<8x128xf32>
    %127 = vector.broadcast %2 : vector<1x128xf32> to vector<8x128xf32>
    %128 = arith.mulf %125, %127 : vector<8x128xf32>
    %129 = vector.broadcast %3 : vector<1x128xf32> to vector<8x128xf32>
    %130 = arith.mulf %126, %129 : vector<8x128xf32>
    %131 = arith.addf %128, %130 : vector<8x128xf32>
    %132 = arith.mulf %123, %124 : vector<8x128xf32>
    %133 = arith.truncf %132 : vector<8x128xf32> to vector<8x128xbf16>
    %c0_58 = arith.constant 0 : index
    %c0_59 = arith.constant 0 : index
    %134 = vector.load %arg10[%c0_58, %c0_59] : memref<128x128xbf16, #tpu.memory_space<vmem>>, vector<128x128xbf16>
    %cst_60 = arith.constant dense<0.000000e+00> : vector<8x128xf32>
    %135 = tpu.matmul %133, %134, %cst_60 {dimension_numbers = #tpu.dot_dimension_numbers<[1], [0], [0], [1], [0, 0, 1, 1], [], []>} : vector<8x128xbf16>, vector<128x128xbf16>, vector<8x128xf32> -> vector<8x128xf32>
    %136 = math.absf %135 : vector<8x128xf32>
    %cst_61 = arith.constant 0.000000e+00 : f32
    %137 = vector.broadcast %cst_61 : f32 to vector<8x128xf32>
    %138 = arith.subf %137, %136 : vector<8x128xf32>
    %139 = math.exp %138 : vector<8x128xf32>
    %cst_62 = arith.constant 0.000000e+00 : f32
    %140 = vector.broadcast %cst_62 : f32 to vector<8x128xf32>
    %141 = arith.cmpf oge, %135, %140 : vector<8x128xf32>
    %cst_63 = arith.constant 1.000000e+00 : f32
    %142 = vector.broadcast %cst_63 : f32 to vector<8x128xf32>
    %143 = arith.select %141, %142, %139 : vector<8x128xi1>, vector<8x128xf32>
    %cst_64 = arith.constant 0.000000e+00 : f32
    %144 = vector.broadcast %cst_64 : f32 to vector<8x128xf32>
    %145 = arith.cmpf oge, %135, %144 : vector<8x128xf32>
    %cst_65 = arith.constant 1.000000e+00 : f32
    %146 = vector.broadcast %cst_65 : f32 to vector<8x128xf32>
    %147 = arith.select %145, %139, %146 : vector<8x128xi1>, vector<8x128xf32>
    %148 = vector.broadcast %1 : f32 to vector<8x128xf32>
    %149 = arith.mulf %148, %147 : vector<8x128xf32>
    %150 = arith.addf %149, %143 : vector<8x128xf32>
    %151 = tpu.reciprocal %150 {approx = true} : vector<8x128xf32> -> vector<8x128xf32>
    %152 = arith.mulf %143, %151 : vector<8x128xf32>
    %153 = arith.mulf %152, %131 : vector<8x128xf32>
    %154 = arith.truncf %153 : vector<8x128xf32> to vector<8x128xbf16>
    %c1_66 = arith.constant 1 : index
    %c0_67 = arith.constant 0 : index
    %c0_68 = arith.constant 0 : index
    %155 = vector.load %arg6[%c1_66, %c0_67, %c0_68] : memref<2x128x128xbf16, #tpu.memory_space<vmem>>, vector<1x128x128xbf16>
    %156 = vector.shape_cast %155 : vector<1x128x128xbf16> to vector<128x128xbf16>
    %cst_69 = arith.constant dense<0.000000e+00> : vector<8x128xf32>
    %157 = tpu.matmul %154, %156, %cst_69 {dimension_numbers = #tpu.dot_dimension_numbers<[1], [0], [0], [1], [0, 0, 1, 1], [], []>} : vector<8x128xbf16>, vector<128x128xbf16>, vector<8x128xf32> -> vector<8x128xf32>
    %158 = arith.addf %98, %157 : vector<8x128xf32>
    %c1_70 = arith.constant 1 : index
    %c0_71 = arith.constant 0 : index
    %c0_72 = arith.constant 0 : index
    %159 = vector.load %arg7[%c1_70, %c0_71, %c0_72] : memref<2x1x128xf32, #tpu.memory_space<vmem>>, vector<1x1x128xf32>
    %160 = vector.shape_cast %159 : vector<1x1x128xf32> to vector<1x128xf32>
    %161 = arith.mulf %158, %158 : vector<8x128xf32>
    %cst_73 = arith.constant dense<0.000000e+00> : vector<8xf32>
    %162 = vector.multi_reduction <add>, %161, %cst_73 [1] : vector<8x128xf32> to vector<8xf32>
    %163 = vector.shape_cast %162 : vector<8xf32> to vector<8x1xf32>
    %cst_74 = arith.constant 0.010416667 : f32
    %164 = vector.broadcast %cst_74 : f32 to vector<8x1xf32>
    %165 = arith.mulf %163, %164 : vector<8x1xf32>
    %cst_75 = arith.constant 9.99999974E-6 : f32
    %166 = vector.broadcast %cst_75 : f32 to vector<8x1xf32>
    %167 = arith.addf %165, %166 : vector<8x1xf32>
    %168 = math.rsqrt %167 : vector<8x1xf32>
    %169 = vector.broadcast %168 : vector<8x1xf32> to vector<8x128xf32>
    %170 = arith.mulf %158, %169 : vector<8x128xf32>
    %171 = vector.broadcast %160 : vector<1x128xf32> to vector<8x128xf32>
    %172 = arith.mulf %170, %171 : vector<8x128xf32>
    %173 = arith.truncf %172 : vector<8x128xf32> to vector<8x128xbf16>
    %c1_76 = arith.constant 1 : index
    %c0_77 = arith.constant 0 : index
    %c0_78 = arith.constant 0 : index
    %174 = vector.load %arg8[%c1_76, %c0_77, %c0_78] : memref<2x128x512xbf16, #tpu.memory_space<vmem>>, vector<1x128x512xbf16>
    %175 = vector.shape_cast %174 : vector<1x128x512xbf16> to vector<128x512xbf16>
    %cst_79 = arith.constant dense<0.000000e+00> : vector<8x512xf32>
    %176 = tpu.matmul %173, %175, %cst_79 {dimension_numbers = #tpu.dot_dimension_numbers<[1], [0], [0], [1], [0, 0, 1, 1], [], []>} : vector<8x128xbf16>, vector<128x512xbf16>, vector<8x512xf32> -> vector<8x512xf32>
    %177 = vector.extract_strided_slice %176 {offsets = [0, 0], sizes = [8, 256], strides = [1, 1]} : vector<8x512xf32> to vector<8x256xf32>
    %178 = vector.extract_strided_slice %176 {offsets = [0, 256], sizes = [8, 256], strides = [1, 1]} : vector<8x512xf32> to vector<8x256xf32>
    %cst_80 = arith.constant 0.000000e+00 : f32
    %179 = vector.broadcast %cst_80 : f32 to vector<8x256xf32>
    %180 = arith.subf %179, %177 : vector<8x256xf32>
    %181 = math.exp %180 : vector<8x256xf32>
    %cst_81 = arith.constant 1.000000e+00 : f32
    %182 = vector.broadcast %cst_81 : f32 to vector<8x256xf32>
    %183 = arith.addf %182, %181 : vector<8x256xf32>
    %184 = tpu.reciprocal %183 {approx = true} : vector<8x256xf32> -> vector<8x256xf32>
    %185 = arith.mulf %177, %184 : vector<8x256xf32>
    %186 = arith.mulf %185, %178 : vector<8x256xf32>
    %187 = arith.truncf %186 : vector<8x256xf32> to vector<8x256xbf16>
    %c1_82 = arith.constant 1 : index
    %c0_83 = arith.constant 0 : index
    %c0_84 = arith.constant 0 : index
    %188 = vector.load %arg9[%c1_82, %c0_83, %c0_84] : memref<2x256x128xbf16, #tpu.memory_space<vmem>>, vector<1x256x128xbf16>
    %189 = vector.shape_cast %188 : vector<1x256x128xbf16> to vector<256x128xbf16>
    %cst_85 = arith.constant dense<0.000000e+00> : vector<8x128xf32>
    %190 = tpu.matmul %187, %189, %cst_85 {dimension_numbers = #tpu.dot_dimension_numbers<[1], [0], [0], [1], [0, 0, 1, 1], [], []>} : vector<8x256xbf16>, vector<256x128xbf16>, vector<8x128xf32> -> vector<8x128xf32>
    %191 = arith.addf %158, %190 : vector<8x128xf32>
    %c0_86 = arith.constant 0 : index
    %c0_87 = arith.constant 0 : index
    %192 = vector.load %arg12[%c0_86, %c0_87] : memref<1x128xf32, #tpu.memory_space<vmem>>, vector<1x128xf32>
    %193 = arith.mulf %191, %191 : vector<8x128xf32>
    %cst_88 = arith.constant dense<0.000000e+00> : vector<8xf32>
    %194 = vector.multi_reduction <add>, %193, %cst_88 [1] : vector<8x128xf32> to vector<8xf32>
    %195 = vector.shape_cast %194 : vector<8xf32> to vector<8x1xf32>
    %cst_89 = arith.constant 0.010416667 : f32
    %196 = vector.broadcast %cst_89 : f32 to vector<8x1xf32>
    %197 = arith.mulf %195, %196 : vector<8x1xf32>
    %cst_90 = arith.constant 9.99999974E-6 : f32
    %198 = vector.broadcast %cst_90 : f32 to vector<8x1xf32>
    %199 = arith.addf %197, %198 : vector<8x1xf32>
    %200 = math.rsqrt %199 : vector<8x1xf32>
    %201 = vector.broadcast %200 : vector<8x1xf32> to vector<8x128xf32>
    %202 = arith.mulf %191, %201 : vector<8x128xf32>
    %203 = vector.broadcast %192 : vector<1x128xf32> to vector<8x128xf32>
    %204 = arith.mulf %202, %203 : vector<8x128xf32>
    %205 = arith.truncf %204 : vector<8x128xf32> to vector<8x128xbf16>
    %c0_91 = arith.constant 0 : index
    %c0_92 = arith.constant 0 : index
    %206 = vector.load %arg13[%c0_91, %c0_92] : memref<128x128xbf16, #tpu.memory_space<vmem>>, vector<128x128xbf16>
    %cst_93 = arith.constant dense<0.000000e+00> : vector<8x128xf32>
    %207 = tpu.matmul %205, %206, %cst_93 {dimension_numbers = #tpu.dot_dimension_numbers<[1], [0], [0], [1], [0, 0, 1, 1], [], []>} : vector<8x128xbf16>, vector<128x128xbf16>, vector<8x128xf32> -> vector<8x128xf32>
    %c0_94 = arith.constant 0 : index
    %c0_95 = arith.constant 0 : index
    %208 = vector.load %arg14[%c0_94, %c0_95] : memref<8x128xf32, #tpu.memory_space<vmem>>, vector<8x128xf32>
    tpu.vector_store %arg14[%c0_94, %c0_95], %207 {strides = array<i32>} : memref<8x128xf32, #tpu.memory_space<vmem>>, vector<8x128xf32>,
    return
  }
}

</mosaic_0001>

<bundles_post_ra>
// kernel: tile.13
= control target key start
LH: loop header
LB: loop body
LE: loop exit
PB: predicated region body
PF: predicated region fallthrough
CT: control target
= control target key end

     0   :  { %s67_s10 = smov 14   ;;  %s68_s11 = smov 10   ;;  %vm3_vm0 = vcmask 15360   ;;  %vm9_vm1 = vcmask 130160   ;;  %vm15_vm2 = vcmask 113760   ;;  %vm21_vm3 = vcmask 97360   ;;  %s111_s0 = inlined_call_operand.vmem [shape: f32[8,2], index: 0, kind: input, shape index: {}]   ;;  %s112_s1 = inlined_call_operand.vmem [shape: f32[16], index: 1, kind: output, shape index: {}]  }
   0x1   :  { %v53_v0 = vld [vmem:[%s111_s0 + $0x7] sm:$0x1]   ;;  %v55_v1 = vld [vmem:[%s111_s0 + $0x5] sm:$0x1]   ;;  %v57_v2 = vld [vmem:[%s111_s0 + $0x3] sm:$0x1]  }
   0x2   :  { %7 = vrot.lane.b32.xlu0 %v53_v0, %s67_s10  ;;  %19 = vrot.lane.b32.xlu1 %v55_v1, %s68_s11  ;;  %s69_s14 = smov 6   ;;  %v54_v3 = vld [vmem:[%s111_s0 + $0x6] sm:$0x1]   ;;  %v56_v4 = vld [vmem:[%s111_s0 + $0x4] sm:$0x1]   ;;  %s70_s21 = smov 12  }
   0x3   :  { %31 = vrot.lane.b32.xlu2 %v57_v2, %s69_s14  ;;  %v58_v5 = vld [vmem:[%s111_s0 + $0x2] sm:$0x1]   ;;  %s71_s22 = smov 8   ;;  %s72_s23 = smov 4   ;;  %v59_v6 = vld [vmem:[%s111_s0 + $0x1] sm:$0x1]  }
   0x4   :  { %s73_s26 = smov 2   ;;  %v2_v7 = vld [vmem:[%s111_s0] sm:$0x1]   ;;  %vm27_vm4 = vcmask 80960   ;;  %vm33_vm5 = vcmask 64560   ;;  %vm39_vm6 = vcmask 48160  }
   0x5   :  { %4 = vst.msk [vmem:[#allocation0] sm:$0x1] %vm3_vm0, %v2_v7   ;;  %vm45_vm7 = vcmask 31760  }
   0xa   :  { %13 = vrot.lane.b32.xlu0 %v54_v3, %s70_s21  ;;  %25 = vrot.lane.b32.xlu1 %v56_v4, %s71_s22 }
   0xb   :  { %37 = vrot.lane.b32.xlu2 %v58_v5, %s72_s23 }
  0x12   :  { %43 = vrot.lane.b32.xlu0 %v59_v6, %s73_s26 }
  0x5d   :  { %v32_v8 = vpop.permute.xlu2 %31  }
  0x65   :  { %v38_v9 = vpop.permute.xlu2 %37  }
  0x74   :  { %v8_v10 = vpop.permute.xlu0 %7   ;;  %v20_v11 = vpop.permute.xlu1 %19  }
  0x75   :  { %10 = vst.msk [vmem:[#allocation0] sm:$0x1] %vm9_vm1, %v8_v10  }
  0x7c   :  { %v14_v12 = vpop.permute.xlu0 %13   ;;  %v26_v13 = vpop.permute.xlu1 %25  }
  0x7d   :  { %16 = vst.msk [vmem:[#allocation0] sm:$0x1] %vm15_vm2, %v14_v12  }
  0x7e   :  { %22 = vst.msk [vmem:[#allocation0] sm:$0x1] %vm21_vm3, %v20_v11  }
  0x7f   :  { %28 = vst.msk [vmem:[#allocation0] sm:$0x1] %vm27_vm4, %v26_v13  }
  0x80   :  { %34 = vst.msk [vmem:[#allocation0] sm:$0x1] %vm33_vm5, %v32_v8  }
  0x81   :  { %40 = vst.msk [vmem:[#allocation0] sm:$0x1] %vm39_vm6, %v38_v9  }
  0x84   :  { %v44_v14 = vpop.permute.xlu0 %43  }
  0x85   :  { %46 = vst.msk [vmem:[#allocation0] sm:$0x1] %vm45_vm7, %v44_v14  }
  0x8c   :  { %v49_v15 = vld [vmem:[#allocation0] sm:$0x1] }
  0x8d   :  { %52 = vst [vmem:[%s112_s1] sm:$0x1] %v49_v15 }

// kernel: tile.14
= control target key start
LH: loop header
LB: loop body
LE: loop exit
PB: predicated region body
PF: predicated region fallthrough
CT: control target
= control target key end

     0   :  { %s22_s0 = inlined_call_operand.vmem [shape: f32[16], index: 0, kind: input, shape index: {}]   ;;  %s23_s1 = inlined_call_operand.vmem [shape: f32[8,16], index: 1, kind: output, shape index: {}]  }
   0x1   :  { %v4_v0 = vld [vmem:[%s22_s0] ss:$0 sm:$0xff] }
   0x2   :  { %5 = vst [vmem:[%s23_s1] sm:$0xff] %v4_v0 }

// kernel: tile.15
= control target key start
LH: loop header
LB: loop body
LE: loop exit
PB: predicated region body
PF: predicated region fallthrough
CT: control target
= control target key end

     0   :  { %s67_s10 = smov 112   ;;  %s68_s11 = smov 80   ;;  %vm3_vm0 = vcmask 130048   ;;  %vm9_vm1 = vcmask 1048448   ;;  %vm15_vm2 = vcmask 917248   ;;  %vm21_vm3 = vcmask 786048   ;;  %s111_s0 = inlined_call_operand.vmem [shape: f32[8,16], index: 0, kind: input, shape index: {}]   ;;  %s112_s1 = inlined_call_operand.vmem [shape: f32[1,128], index: 1, kind: output, shape index: {}]  }
   0x1   :  { %v53_v0 = vld [vmem:[%s111_s0 + $0x7] sm:$0x1]   ;;  %v55_v1 = vld [vmem:[%s111_s0 + $0x5] sm:$0x1]   ;;  %v57_v2 = vld [vmem:[%s111_s0 + $0x3] sm:$0x1]  }
   0x2   :  { %7 = vrot.lane.b32.xlu0 %v53_v0, %s67_s10  ;;  %19 = vrot.lane.b32.xlu1 %v55_v1, %s68_s11  ;;  %s69_s14 = smov 48   ;;  %v54_v3 = vld [vmem:[%s111_s0 + $0x6] sm:$0x1]   ;;  %v56_v4 = vld [vmem:[%s111_s0 + $0x4] sm:$0x1]   ;;  %s70_s21 = smov 96  }
   0x3   :  { %31 = vrot.lane.b32.xlu2 %v57_v2, %s69_s14  ;;  %v58_v5 = vld [vmem:[%s111_s0 + $0x2] sm:$0x1]   ;;  %s71_s22 = smov 64   ;;  %s72_s23 = smov 32   ;;  %v59_v6 = vld [vmem:[%s111_s0 + $0x1] sm:$0x1]  }
   0x4   :  { %s73_s26 = smov 16   ;;  %v2_v7 = vld [vmem:[%s111_s0] sm:$0x1]   ;;  %vm27_vm4 = vcmask 654848   ;;  %vm33_vm5 = vcmask 523648   ;;  %vm39_vm6 = vcmask 392448  }
   0x5   :  { %4 = vst.msk [vmem:[#allocation0] sm:$0x1] %vm3_vm0, %v2_v7   ;;  %vm45_vm7 = vcmask 261248  }
   0xa   :  { %13 = vrot.lane.b32.xlu0 %v54_v3, %s70_s21  ;;  %25 = vrot.lane.b32.xlu1 %v56_v4, %s71_s22 }
   0xb   :  { %37 = vrot.lane.b32.xlu2 %v58_v5, %s72_s23 }
  0x12   :  { %43 = vrot.lane.b32.xlu0 %v59_v6, %s73_s26 }
  0x5d   :  { %v32_v8 = vpop.permute.xlu2 %31  }
  0x65   :  { %v38_v9 = vpop.permute.xlu2 %37  }
  0x74   :  { %v8_v10 = vpop.permute.xlu0 %7   ;;  %v20_v11 = vpop.permute.xlu1 %19  }
  0x75   :  { %10 = vst.msk [vmem:[#allocation0] sm:$0x1] %vm9_vm1, %v8_v10  }
  0x7c   :  { %v14_v12 = vpop.permute.xlu0 %13   ;;  %v26_v13 = vpop.permute.xlu1 %25  }
  0x7d   :  { %16 = vst.msk [vmem:[#allocation0] sm:$0x1] %vm15_vm2, %v14_v12  }
  0x7e   :  { %22 = vst.msk [vmem:[#allocation0] sm:$0x1] %vm21_vm3, %v20_v11  }
  0x7f   :  { %28 = vst.msk [vmem:[#allocation0] sm:$0x1] %vm27_vm4, %v26_v13  }
  0x80   :  { %34 = vst.msk [vmem:[#allocation0] sm:$0x1] %vm33_vm5, %v32_v8  }
  0x81   :  { %40 = vst.msk [vmem:[#allocation0] sm:$0x1] %vm39_vm6, %v38_v9  }
  0x84   :  { %v44_v14 = vpop.permute.xlu0 %43  }
  0x85   :  { %46 = vst.msk [vmem:[#allocation0] sm:$0x1] %vm45_vm7, %v44_v14  }
  0x8c   :  { %v49_v15 = vld [vmem:[#allocation0] sm:$0x1] }
  0x8d   :  { %52 = vst [vmem:[%s112_s1] sm:$0x1] %v49_v15 }

// kernel: transformer_forward.1
= control target key start
LH: loop header
LB: loop body
LE: loop exit
PB: predicated region body
PF: predicated region fallthrough
CT: control target
= control target key end

     0   :  { %20 = vsyncpa [#allocation4], 0  ;;  %s3395_s0 = inlined_call_operand.<no memory space> [shape: s32[1], index: 0, kind: input, shape index: {}]   ;;  %s3396_s1 = inlined_call_operand.vmem [shape: f32[8,128], index: 1, kind: input, shape index: {}]   ;;  %s3397_s2 = inlined_call_operand.vmem [shape: f32[1,128], index: 2, kind: input, shape index: {}]   ;;  %s3398_s3 = inlined_call_operand.vmem [shape: f32[1,128], index: 3, kind: input, shape index: {}]   ;;  %s3399_s4 = inlined_call_operand.vmem [shape: f32[2,1,128], index: 4, kind: input, shape index: {}]   ;;  %s3400_s5 = inlined_call_operand.hbm [shape: bf16[2,128,384], index: 5, kind: input, shape index: {}]   ;;  %s3401_s6 = inlined_call_operand.hbm [shape: bf16[2,128,128], index: 6, kind: input, shape index: {}]   ;;  %s3402_s7 = inlined_call_operand.vmem [shape: f32[2,1,128], index: 7, kind: input, shape index: {}]   ;;  %s3403_s8 = inlined_call_operand.hbm [shape: bf16[2,128,512], index: 8, kind: input, shape index: {}]   ;;  %s3404_s9 = inlined_call_operand.hbm [shape: bf16[2,256,128], index: 9, kind: input, shape index: {}]   ;;  %s3405_s10 = inlined_call_operand.vmem [shape: bf16[128,128], index: 10, kind: input, shape index: {}]   ;;  %s3406_s11 = inlined_call_operand.hbm [shape: f32[128,128], index: 11, kind: input, shape index: {}]   ;;  %s3407_s12 = inlined_call_operand.vmem [shape: f32[1,128], index: 12, kind: input, shape index: {}]   ;;  %s3408_s13 = inlined_call_operand.hbm [shape: bf16[128,128], index: 13, kind: input, shape index: {}]   ;;  %s3409_s14 = inlined_call_operand.vmem [shape: f32[8,128], index: 14, kind: output, shape index: {}]  }
   0x1   :  { %21 = vsyncpa [#allocation6], 0 }
   0x2   :  { %22 = vsyncpa [#allocation9], 0  ;;  %s51_s15 = sshll.u32 %s3401_s6, 4  ;;  %s52_s15 = int_to_ptr.hbm [resolvable:$true] %s51_s15 }
   0x3   :  { %23 = vsyncpa [#allocation12], 0  ;;  %s3057_s16 = smov [#allocation5]   ;;  %s79_s20 = sshll.u32 %s3404_s9, 4  ;;  %s80_s20 = int_to_ptr.hbm [resolvable:$true] %s79_s20 }
   0x4   :  { %s53_s17 = sshll.u32 %s3057_s16, 4  ;;  %s3058_s21 = smov 64   ;;  %s54_s17 = int_to_ptr.vmem [resolvable:$true] %s53_s17 }
   0x5   :  { %s3059_s22 = smov 4   ;;  %s3060_s23 = smov [#allocation8]  }
   0x6   :  { %59 = dma.hbm_to_vmem [thread:$0]  %s52_s15, 2048, %s54_s17, [#allocation6], %s3058_s21, %s3058_s21, %s3059_s22  }
   0x7   :  { %s81_s24 = sshll.u32 %s3060_s23, 4  ;;  %s38_s26 = sshll.u32 %s3400_s5, 4  ;;  %s82_s24 = int_to_ptr.vmem [resolvable:$true] %s81_s24  ;;  %s39_s26 = int_to_ptr.hbm [resolvable:$true] %s38_s26 }
   0x8   :  { %87 = dma.hbm_to_vmem [thread:$0]  %s80_s20, 4096, %s82_s24, [#allocation9], %s3058_s21, %s3058_s21, %s3059_s22  }
   0x9   :  { %s3061_s9 = smov [#allocation3]   ;;  %s66_s30 = sshll.u32 %s3403_s8, 4  ;;  %s67_s30 = int_to_ptr.hbm [resolvable:$true] %s66_s30 }
   0xa   :  { %s40_s27 = sshll.u32 %s3061_s9, 4  ;;  %s3062_s15 = smov 192   ;;  %s41_s27 = int_to_ptr.vmem [resolvable:$true] %s40_s27 }
   0xb   :  { %s3063_s16 = smov 12   ;;  %s3064_s17 = smov [#allocation7]  }
   0xc   :  { %46 = dma.hbm_to_vmem [thread:$0]  %s39_s26, 6144, %s41_s27, [#allocation4], %s3062_s15, %s3062_s15, %s3063_s16  }
   0xd   :  { %s68_s18 = sshll.u32 %s3064_s17, 4  ;;  %s3065_s5 = smov 256   ;;  %s69_s18 = int_to_ptr.vmem [resolvable:$true] %s68_s18 }
   0xe   :  { %s3066_s19 = smov 16   ;;  %s94_s20 = sshll.u32 %s3406_s11, 4  ;;  %s95_s20 = int_to_ptr.hbm [resolvable:$true] %s94_s20 }
   0xf   :  { %74 = dma.hbm_to_vmem [thread:$0]  %s67_s30, 8192, %s69_s18, [#allocation6], %s3065_s5, %s3065_s5, %s3066_s19  }
  0x10   :  { %s3067_s24 = smov [#allocation10]   ;;  %s109_s28 = sshll.u32 %s3408_s13, 4  ;;  %s110_s28 = int_to_ptr.hbm [resolvable:$true] %s109_s28 }
  0x11   :  { %s96_s6 = sshll.u32 %s3067_s24, 4  ;;  %s3068_s26 = smov 128   ;;  %s97_s6 = int_to_ptr.vmem [resolvable:$true] %s96_s6 }
  0x12   :  { %s3069_s27 = smov 8   ;;  %s3070_s29 = smov [#allocation11]  }
  0x13   :  { %102 = dma.hbm_to_vmem [thread:$0]  %s95_s20, 2048, %s97_s6, [#allocation9], %s3068_s26, %s3068_s26, %s3069_s27  }
  0x14   :  { %s111_s15 = sshll.u32 %s3070_s29, 4  ;;  %s112_s15 = int_to_ptr.vmem [resolvable:$true] %s111_s15 }
  0x15   :  { %117 = dma.hbm_to_vmem [thread:$0]  %s110_s28, 1024, %s112_s15, [#allocation12], %s3058_s21, %s3058_s21, %s3059_s22  }
  0x16   :  { %3049 = dma.done.wait [#allocation4], 6144  }
  0x17   :  { %3050 = vsyncadd [#allocation4], 4294961152 }
  0x18   :  { %3051 = dma.done.wait [#allocation6], 10240  }
  0x19   :  { %3052 = vsyncadd [#allocation6], 4294957056 }
  0x1a   :  { %3053 = dma.done.wait [#allocation9], 6144  }
  0x1b   :  { %3054 = vsyncadd [#allocation9], 4294961152 }
  0x1c   :  { %3055 = dma.done.wait [#allocation12], 1024  }
  0x1d   :  { %3056 = vsyncadd [#allocation12], 4294966272  ;;  %v3176_v0 = vld [vmem:[%s3396_s1] sm:$0xff]  ;;  %v2054_v1 = vld [vmem:[#allocation3 + $0xa8] sm:$0xf] }
  0x1e   :  { %v2696_v2 = vld [vmem:[#allocation3 + $0xb0] sm:$0xf0]  ;;  %v164_v3 = vmul.f32 %v3176_v0, %v3176_v0  ;;  %v2695_v5 = vld [vmem:[#allocation3 + $0xac] sm:$0xf]  ;;  %v2056_v6 = vld [vmem:[#allocation3 + $0xb4] sm:$0xf0] }
  0x1f   :  { %v2055_v4 = vor.u32 %v2696_v2, %v2054_v1  ;;  %v2062_v7 = vld [vmem:[#allocation3 + $0xb0] sm:$0xf]  ;;  %v2059_v8 = vor.u32 %v2695_v5, %v2056_v6  ;;  %v2697_v9 = vld [vmem:[#allocation3 + $0xb8] sm:$0xf0]  ;;  %v2692_v13 = vld [vmem:[#allocation3 + $0x94] sm:$0xf] }
  0x20   :  { %165 = vadd.xlane.f32.xlu0 %v164_v3  ;;  %v2063_v10 = vor.u32 %v2697_v9, %v2062_v7  ;;  %v2042_v11 = vld [vmem:[#allocation3 + $0x90] sm:$0xf]  ;;  %v2693_v12 = vld [vmem:[#allocation3 + $0x98] sm:$0xf0]  ;;  %v2044_v15 = vld [vmem:[#allocation3 + $0x9c] sm:$0xf0] }
  0x21   :  { %345 = vmatpush.bf16.msra.mxu0 %v2055_v4  ;;  %358 = vmatpush.bf16.msra.mxu1 %v2059_v8  ;;  %v2043_v14 = vor.u32 %v2693_v12, %v2042_v11  ;;  %v2050_v16 = vld [vmem:[#allocation3 + $0x98] sm:$0xf]  ;;  %v2694_v17 = vld [vmem:[#allocation3 + $0xa0] sm:$0xf0]  ;;  %v2047_v18 = vor.u32 %v2692_v13, %v2044_v15  ;;  %v2689_v22 = vld [vmem:[#allocation3 + $0x7c] sm:$0xf] }
  0x22   :  { %371 = vmatpush.bf16.msra.mxu2 %v2063_v10  ;;  %v2051_v19 = vor.u32 %v2694_v17, %v2050_v16  ;;  %v2030_v20 = vld [vmem:[#allocation3 + $0x78] sm:$0xf]  ;;  %v2690_v21 = vld [vmem:[#allocation3 + $0x80] sm:$0xf0]  ;;  %v2032_v24 = vld [vmem:[#allocation3 + $0x84] sm:$0xf0] }
  0x23   :  { %v2031_v23 = vor.u32 %v2690_v21, %v2030_v20  ;;  %v2038_v25 = vld [vmem:[#allocation3 + $0x80] sm:$0xf]  ;;  %v2691_v26 = vld [vmem:[#allocation3 + $0x88] sm:$0xf0]  ;;  %v2035_v27 = vor.u32 %v2689_v22, %v2032_v24  ;;  %v2686_v31 = vld [vmem:[#allocation3 + $0x64] sm:$0xf] }
  0x24   :  { %v2039_v28 = vor.u32 %v2691_v26, %v2038_v25  ;;  %v2018_v29 = vld [vmem:[#allocation3 + $0x60] sm:$0xf]  ;;  %v2687_v30 = vld [vmem:[#allocation3 + $0x68] sm:$0xf0]  ;;  %v2020_v33 = vld [vmem:[#allocation3 + $0x6c] sm:$0xf0] }
  0x25   :  { %346 = vmatpush.bf16.msra.mxu0 %v2043_v14  ;;  %359 = vmatpush.bf16.msra.mxu1 %v2047_v18  ;;  %v2019_v32 = vor.u32 %v2687_v30, %v2018_v29  ;;  %v2026_v34 = vld [vmem:[#allocation3 + $0x68] sm:$0xf]  ;;  %v2688_v35 = vld [vmem:[#allocation3 + $0x70] sm:$0xf0]  ;;  %v2023_v36 = vor.u32 %v2686_v31, %v2020_v33  ;;  %v2683_v40 = vld [vmem:[#allocation3 + $0x4c] sm:$0xf] }
  0x26   :  { %372 = vmatpush.bf16.msra.mxu2 %v2051_v19  ;;  %v2027_v37 = vor.u32 %v2688_v35, %v2026_v34  ;;  %v2006_v38 = vld [vmem:[#allocation3 + $0x48] sm:$0xf]  ;;  %v2684_v39 = vld [vmem:[#allocation3 + $0x50] sm:$0xf0]  ;;  %v2008_v42 = vld [vmem:[#allocation3 + $0x54] sm:$0xf0] }
  0x27   :  { %v2007_v41 = vor.u32 %v2684_v39, %v2006_v38  ;;  %v2014_v43 = vld [vmem:[#allocation3 + $0x50] sm:$0xf]  ;;  %v2685_v44 = vld [vmem:[#allocation3 + $0x58] sm:$0xf0]  ;;  %v2011_v45 = vor.u32 %v2683_v40, %v2008_v42  ;;  %v2680_v49 = vld [vmem:[#allocation3 + $0x34] sm:$0xf] }
  0x28   :  { %v2015_v46 = vor.u32 %v2685_v44, %v2014_v43  ;;  %v1994_v47 = vld [vmem:[#allocation3 + $0x30] sm:$0xf]  ;;  %v2681_v48 = vld [vmem:[#allocation3 + $0x38] sm:$0xf0]  ;;  %v1996_v51 = vld [vmem:[#allocation3 + $0x3c] sm:$0xf0] }
  0x29   :  { %347 = vmatpush.bf16.msra.mxu0 %v2031_v23  ;;  %360 = vmatpush.bf16.msra.mxu1 %v2035_v27  ;;  %v1995_v50 = vor.u32 %v2681_v48, %v1994_v47  ;;  %v2002_v52 = vld [vmem:[#allocation3 + $0x38] sm:$0xf]  ;;  %v2682_v53 = vld [vmem:[#allocation3 + $0x40] sm:$0xf0]  ;;  %v1999_v54 = vor.u32 %v2680_v49, %v1996_v51  ;;  %v2677_v58 = vld [vmem:[#allocation3 + $0x1c] sm:$0xf] }
  0x2a   :  { %373 = vmatpush.bf16.msra.mxu2 %v2039_v28  ;;  %v2003_v55 = vor.u32 %v2682_v53, %v2002_v52  ;;  %v1982_v56 = vld [vmem:[#allocation3 + $0x18] sm:$0xf]  ;;  %v2678_v57 = vld [vmem:[#allocation3 + $0x20] sm:$0xf0]  ;;  %v1984_v60 = vld [vmem:[#allocation3 + $0x24] sm:$0xf0] }
  0x2b   :  { %v1983_v59 = vor.u32 %v2678_v57, %v1982_v56  ;;  %v1990_v61 = vld [vmem:[#allocation3 + $0x20] sm:$0xf]  ;;  %v2679_v62 = vld [vmem:[#allocation3 + $0x28] sm:$0xf0]  ;;  %v1987_v63 = vor.u32 %v2677_v58, %v1984_v60  ;;  %v2674_v4 = vld [vmem:[#allocation3 + $0x4] sm:$0xf] }
  0x2c   :  { %v1991_v1 = vor.u32 %v2679_v62, %v1990_v61  ;;  %v1970_v2 = vld [vmem:[#allocation3] sm:$0xf]  ;;  %v2675_v3 = vld [vmem:[#allocation3 + $0x8] sm:$0xf0]  ;;  %v1972_v6 = vld [vmem:[#allocation3 + $0xc] sm:$0xf0] }
  0x2d   :  { %348 = vmatpush.bf16.msra.mxu0 %v2019_v32  ;;  %361 = vmatpush.bf16.msra.mxu1 %v2023_v36  ;;  %v1971_v5 = vor.u32 %v2675_v3, %v1970_v2  ;;  %v1978_v7 = vld [vmem:[#allocation3 + $0x8] sm:$0xf]  ;;  %v2676_v8 = vld [vmem:[#allocation3 + $0x10] sm:$0xf0]  ;;  %v1975_v9 = vor.u32 %v2674_v4, %v1972_v6  ;;  %v3180_v11 = vld [vmem:[#allocation10 + $0x78] sm:$0xff] }
  0x2e   :  { %374 = vmatpush.bf16.msra.mxu2 %v2027_v37  ;;  %v1979_v10 = vor.u32 %v2676_v8, %v1978_v7  ;;  %v3182_v12 = vld [vmem:[#allocation10 + $0x70] sm:$0xff]  ;;  %384 = vmatpush.msra.mxu3 %v3180_v11  ;;  %v3186_v14 = vld [vmem:[#allocation10 + $0x68] sm:$0xff]  ;;  %v3190_v16 = vld [vmem:[#allocation10 + $0x60] sm:$0xff] }
  0x2f   :  { %v3194_v18 = vld [vmem:[#allocation10 + $0x58] sm:$0xff]  ;;  %v3198_v19 = vld [vmem:[#allocation10 + $0x50] sm:$0xff]  ;;  %v3202_v20 = vld [vmem:[#allocation10 + $0x48] sm:$0xff] }
  0x30   :  { %385 = vmatpush.msra.mxu3 %v3182_v12  ;;  %v3206_v21 = vld [vmem:[#allocation10 + $0x40] sm:$0xff]  ;;  %v3210_v24 = vld [vmem:[#allocation10 + $0x38] sm:$0xff]  ;;  %v3214_v26 = vld [vmem:[#allocation10 + $0x30] sm:$0xff] }
  0x31   :  { %349 = vmatpush.bf16.msra.mxu0 %v2007_v41  ;;  %362 = vmatpush.bf16.msra.mxu1 %v2011_v45  ;;  %v3218_v28 = vld [vmem:[#allocation10 + $0x28] sm:$0xff]  ;;  %v3222_v30 = vld [vmem:[#allocation10 + $0x20] sm:$0xff]  ;;  %v3226_v32 = vld [vmem:[#allocation10 + $0x18] sm:$0xff] }
  0x32   :  { %375 = vmatpush.bf16.msra.mxu2 %v2015_v46  ;;  %386 = vmatpush.msra.mxu3 %v3186_v14  ;;  %v2864_v33 = vld [vmem:[%s3399_s4] ss:$0 sm:$0xff]  ;;  %v3233_v35 = vld [vmem:[#allocation10 + $0x10] sm:$0xff]  ;;  %v3238_v37 = vld [vmem:[#allocation10 + $0x8] sm:$0xff] }
  0x33   :  { %v3244_v40 = vld [vmem:[#allocation10] sm:$0xff]  ;;  %v3251_v41 = vld [vmem:[%s3405_s10 + $0x38] sm:$0xff]  ;;  %v3257_v42 = vld [vmem:[%s3405_s10 + $0x30] sm:$0xff] }
  0x34   :  { %387 = vmatpush.msra.mxu3 %v3190_v16  ;;  %v3263_v43 = vld [vmem:[%s3405_s10 + $0x28] sm:$0xff]  ;;  %v3269_v44 = vld [vmem:[%s3405_s10 + $0x20] sm:$0xff]  ;;  %v3275_v45 = vld [vmem:[%s3405_s10 + $0x18] sm:$0xff] }
  0x35   :  { %350 = vmatpush.bf16.msra.mxu0 %v1995_v50  ;;  %363 = vmatpush.bf16.msra.mxu1 %v1999_v54  ;;  %v3281_v48 = vld [vmem:[%s3405_s10 + $0x10] sm:$0xff]  ;;  %v3287_v53 = vld [vmem:[%s3405_s10 + $0x8] sm:$0xff]  ;;  %v3293_v54 = vld [vmem:[%s3405_s10] sm:$0xff]  ;;  %s143_s10 = scvt.s32.f32 %s3395_s0 }
  0x36   :  { %376 = vmatpush.bf16.msra.mxu2 %v2003_v55  ;;  %388 = vmatpush.msra.mxu3 %v3194_v18  ;;  %v3299_v55 = vld [vmem:[%s3397_s2] ss:$0 sm:$0xff]  ;;  %v2711_v2 = vld [vmem:[#allocation5 + $0x28] sm:$0xff]  ;;  %v2709_v4 = vld [vmem:[#allocation5 + $0x18] sm:$0xff] }
  0x37   :  { %v3304_v56 = vld [vmem:[%s3398_s3] ss:$0 sm:$0xff]  ;;  %v2707_v6 = vld [vmem:[#allocation5 + $0x8] sm:$0xff] }
  0x38   :  { %389 = vmatpush.msra.mxu3 %v3198_v19  ;;  %v2710_v3 = vld [vmem:[#allocation5 + $0x20] sm:$0xff] }
  0x39   :  { %351 = vmatpush.bf16.msra.mxu0 %v1983_v59  ;;  %364 = vmatpush.bf16.msra.mxu1 %v1987_v63  ;;  %v2713_v63 = vld [vmem:[#allocation5 + $0x38] sm:$0xff]  ;;  %v2706_v7 = vld [vmem:[#allocation5] sm:$0xff] }
  0x3a   :  { %377 = vmatpush.bf16.msra.mxu2 %v1991_v1  ;;  %390 = vmatpush.msra.mxu3 %v3202_v20  ;;  %v2712_v1 = vld [vmem:[#allocation5 + $0x30] sm:$0xff] }
  0x3c   :  { %391 = vmatpush.msra.mxu3 %v3206_v21 }
  0x3d   :  { %352 = vmatpush.bf16.msra.mxu0 %v1971_v5  ;;  %365 = vmatpush.bf16.msra.mxu1 %v1975_v9  ;;  %v2708_v5 = vld [vmem:[#allocation5 + $0x10] sm:$0xff] }
  0x3e   :  { %378 = vmatpush.bf16.msra.mxu2 %v1979_v10  ;;  %392 = vmatpush.msra.mxu3 %v3210_v24 }
  0x40   :  { %393 = vmatpush.msra.mxu3 %v3214_v26 }
  0x41   :  { %413 = vmatpush.msrb.mxu0 %v3180_v11  ;;  %502 = vmatpush.bf16.msrb.mxu1 %v3251_v41 }
  0x42   :  { %394 = vmatpush.msra.mxu3 %v3218_v28  ;;  %593 = vmatpush.bf16.msrb.mxu2 %v2713_v63  ;;  %v2743_v63 = vld [vmem:[#allocation7 + $0xec] sm:$0xf] }
  0x43   :  { %414 = vmatpush.msrb.mxu0 %v3182_v12 }
  0x44   :  { %395 = vmatpush.msra.mxu3 %v3222_v30 }
  0x45   :  { %415 = vmatpush.msrb.mxu0 %v3186_v14  ;;  %503 = vmatpush.bf16.msrb.mxu1 %v3257_v42 }
  0x46   :  { %396 = vmatpush.msra.mxu3 %v3226_v32  ;;  %594 = vmatpush.bf16.msrb.mxu2 %v2712_v1  ;;  %v2252_v1 = vld [vmem:[#allocation7 + $0xf8] sm:$0xf0] }
  0x47   :  { %416 = vmatpush.msrb.mxu0 %v3190_v16 }
  0x48   :  { %397 = vmatpush.msra.mxu3 %v3233_v35 }
  0x49   :  { %417 = vmatpush.msrb.mxu0 %v3194_v18  ;;  %504 = vmatpush.bf16.msrb.mxu1 %v3263_v43 }
  0x4a   :  { %398 = vmatpush.msra.mxu3 %v3238_v37  ;;  %595 = vmatpush.bf16.msrb.mxu2 %v2711_v2  ;;  %v2255_v2 = vor.u32 %v2743_v63, %v2252_v1  ;;  %v2733_v63 = vld [vmem:[#allocation7 + $0x94] sm:$0xf0] }
  0x4b   :  { %418 = vmatpush.msrb.mxu0 %v3198_v19 }
  0x4c   :  { %399 = vmatpush.msra.mxu3 %v3244_v40 }
  0x4d   :  { %419 = vmatpush.msrb.mxu0 %v3202_v20  ;;  %505 = vmatpush.bf16.msrb.mxu1 %v3269_v44 }
  0x4e   :  { %596 = vmatpush.bf16.msrb.mxu2 %v2710_v3 }
  0x4f   :  { %420 = vmatpush.msrb.mxu0 %v3206_v21 }
  0x51   :  { %421 = vmatpush.msrb.mxu0 %v3210_v24  ;;  %506 = vmatpush.bf16.msrb.mxu1 %v3275_v45 }
  0x52   :  { %597 = vmatpush.bf16.msrb.mxu2 %v2709_v4 }
  0x53   :  { %422 = vmatpush.msrb.mxu0 %v3214_v26 }
  0x55   :  { %423 = vmatpush.msrb.mxu0 %v3218_v28  ;;  %507 = vmatpush.bf16.msrb.mxu1 %v3281_v48 }
  0x56   :  { %598 = vmatpush.bf16.msrb.mxu2 %v2708_v5 }
  0x57   :  { %424 = vmatpush.msrb.mxu0 %v3222_v30 }
  0x59   :  { %425 = vmatpush.msrb.mxu0 %v3226_v32  ;;  %508 = vmatpush.bf16.msrb.mxu1 %v3287_v53 }
  0x5a   :  { %599 = vmatpush.bf16.msrb.mxu2 %v2707_v6  ;;  %v2226_v6 = vld [vmem:[#allocation7 + $0xc0] sm:$0xf] }
  0x5b   :  { %426 = vmatpush.msrb.mxu0 %v3233_v35 }
  0x5d   :  { %427 = vmatpush.msrb.mxu0 %v3238_v37  ;;  %509 = vmatpush.bf16.msrb.mxu1 %v3293_v54 }
  0x5e   :  { %600 = vmatpush.bf16.msrb.mxu2 %v2706_v7  ;;  %v2740_v7 = vld [vmem:[#allocation7 + $0xcc] sm:$0xf0] }
  0x5f   :  { %428 = vmatpush.msrb.mxu0 %v3244_v40 }
  0x93   :  { %v166_v13 = vpop.xlane.xlu0 %165 }
  0x94   :  { %v167_v15 = vmul.f32 0.010416667, %v166_v13 }
  0x96   :  { %v168_v17 = vadd.f32 1e-05, %v167_v15 }
  0x98   :  { %2871 = vrsqrt.f32 %v168_v17  ;;  %vm175_vm1 = vweird.f32 %v168_v17 }
  0x9e   :  { %v2872_v22 = vpop.eup %2871 }
  0x9f   :  { %v170_v23 = vmul.f32 %v2872_v22, %v168_v17  ;;  %vm176_vm0 = vweird.f32 %v2872_v22  ;;  %v3311_v17 = vstv %s143_s10 }
  0xa0   :  { %vm177_vm2 = vmor %vm175_vm1, %vm176_vm0 }
  0xa1   :  { %v171_v25 = vmul.f32 %v2872_v22, %v170_v23 }
  0xa3   :  { %v172_v27 = vmul.f32 0.5, %v171_v25 }
  0xa5   :  { %v173_v29 = vsub.f32 1.5, %v172_v27 }
  0xa7   :  { %v174_v31 = vmul.f32 %v2872_v22, %v173_v29 }
  0xa9   :  { %v178_v34 = vsel %vm177_vm2, %v2872_v22, %v174_v31 }
  0xaa   :  { %v179_v36 = vmul.f32 %v178_v34, %v3176_v0 }
  0xac   :  { %v183_v38 = vmul.f32 %v2864_v33, %v179_v36 }
  0xae   :  { %v184_v39 = vpack.c.bf16 %v183_v38, %v183_v38 }
  0xb0   :  { %353 = vmatmul.bf16.vlgmr.msra.gmra.mxu0 %v184_v39  ;;  %366 = vmatmul.bf16.vlgmr.msra.gmra.mxu1 %v184_v39 }
  0xb1   :  { %379 = vmatmul.bf16.vlgmr.msra.gmra.mxu2 %v184_v39 }
  0xb2   :  { %860 = vmatpush.bf16.msra.mxu2 %v2255_v2 }
 0x12d   :  { %v354_v46 = vpop.f32.mrf.mxu0  ;;  %v367_v47 = vpop.f32.mrf.mxu1 }
 0x12e   :  { %400 = vmatmul.f32.vlgmr.msra.gmra.mxu3 %v354_v46  ;;  %v407_v58 = vmul.f32 %v3299_v55, %v354_v46 }
 0x134   :  { %v380_v49 = vpop.f32.mrf.mxu2 }
 0x135   :  { %429 = vmatmul.f32.vlgmr.msrb.gmra.mxu0 %v380_v49  ;;  %v356_v50 = vpop.f32.mrf.mxu0  ;;  %v369_v51 = vpop.f32.mrf.mxu1  ;;  %v433_v34 = vmul.f32 %v3299_v55, %v380_v49 }
 0x136   :  { %v2242_v50 = vld [vmem:[#allocation7 + $0xe0] sm:$0xf]  ;;  %v2744_v51 = vld [vmem:[#allocation7 + $0xec] sm:$0xf0] }
 0x13c   :  { %v382_v52 = vpop.f32.mrf.mxu2 }
 0x13d   :  { %v2742_v52 = vld [vmem:[#allocation7 + $0xe4] sm:$0xf] }
 0x1b1   :  { %v401_v57 = vpop.f32.mrf.mxu3 }
 0x1b2   :  { %v411_v59 = vmul.f32 %v3304_v56, %v401_v57  ;;  %v430_v31 = vpop.f32.mrf.mxu0  ;;  %v2243_v57 = vor.u32 %v2744_v51, %v2242_v50  ;;  %v2735_v50 = vld [vmem:[#allocation7 + $0xac] sm:$0xf]  ;;  %v2220_v51 = vld [vmem:[#allocation7 + $0xb8] sm:$0xf0] }
 0x1b3   :  { %v434_v33 = vmul.f32 %v3304_v56, %v430_v31  ;;  %v2736_v31 = vld [vmem:[#allocation7 + $0xac] sm:$0xf0] }
 0x1b4   :  { %v412_v60 = vadd.f32 %v411_v59, %v407_v58  ;;  %v2244_v58 = vld [vmem:[#allocation7 + $0xf0] sm:$0xf0]  ;;  %v2250_v59 = vld [vmem:[#allocation7 + $0xe8] sm:$0xf]  ;;  %821 = vmatpush.bf16.msrb.mxu3 %v2243_v57  ;;  %v2194_v57 = vld [vmem:[#allocation7 + $0x80] sm:$0xf] }
 0x1b5   :  { %v435_v38 = vadd.f32 %v434_v33, %v433_v34  ;;  %v2734_v33 = vld [vmem:[#allocation7 + $0xa4] sm:$0xf] }
 0x1b6   :  { %v436_v61 = vmul.f32 %v412_v60, %v367_v47  ;;  %v2745_v60 = vld [vmem:[#allocation7 + $0xf4] sm:$0xf0] }
 0x1b8   :  { %v437_v62 = vpack.c.bf16 %v436_v61, %v436_v61  ;;  %v2247_v61 = vor.u32 %v2742_v52, %v2244_v58  ;;  %v2223_v52 = vor.u32 %v2735_v50, %v2220_v51  ;;  %v2732_v58 = vld [vmem:[#allocation7 + $0x8c] sm:$0xf0]  ;;  %v2723_v50 = vld [vmem:[#allocation7 + $0x4c] sm:$0xf]  ;;  %v2172_v51 = vld [vmem:[#allocation7 + $0x58] sm:$0xf0] }
 0x1ba   :  { %510 = vmatmul.bf16.vlgmr.msrb.gmra.mxu1 %v437_v62  ;;  %v2251_v62 = vor.u32 %v2745_v60, %v2250_v59  ;;  %834 = vmatpush.bf16.msra.mxu0 %v2247_v61  ;;  %v2730_v59 = vld [vmem:[#allocation7 + $0x84] sm:$0xf]  ;;  %v2195_v60 = vor.u32 %v2732_v58, %v2194_v57  ;;  %v2196_v61 = vld [vmem:[#allocation7 + $0x90] sm:$0xf0]  ;;  %v2146_v57 = vld [vmem:[#allocation7 + $0x20] sm:$0xf] }
 0x1bb   :  { %v2199_v1 = vor.u32 %v2730_v59, %v2196_v61  ;;  %v2720_v58 = vld [vmem:[#allocation7 + $0x2c] sm:$0xf0]  ;;  %v2718_v59 = vld [vmem:[#allocation7 + $0x24] sm:$0xf]  ;;  %v2148_v61 = vld [vmem:[#allocation7 + $0x30] sm:$0xf0] }
 0x1bc   :  { %847 = vmatpush.bf16.msra.mxu1 %v2251_v62  ;;  %v2202_v62 = vld [vmem:[#allocation7 + $0x88] sm:$0xf] }
 0x1bd   :  { %v2203_v2 = vor.u32 %v2733_v63, %v2202_v62  ;;  %v2154_v62 = vld [vmem:[#allocation7 + $0x28] sm:$0xf]  ;;  %v2721_v63 = vld [vmem:[#allocation7 + $0x34] sm:$0xf0] }
 0x237   :  { %v511_v8 = vpop.f32.mrf.mxu1 }
 0x238   :  { %v515_v9 = vand.u32 2147483647, %v511_v8  ;;  %vm519_vm3 = vcmp.ge.f32.partialorder %v511_v8, 0.0  ;;  %v2738_v8 = vld [vmem:[#allocation7 + $0xc4] sm:$0xf] }
 0x23a   :  { %v516_v10 = vsub.f32 0.0, %v515_v9  ;;  %v2227_v9 = vor.u32 %v2740_v7, %v2226_v6  ;;  %v2178_v6 = vld [vmem:[#allocation7 + $0x60] sm:$0xf]  ;;  %v2728_v7 = vld [vmem:[#allocation7 + $0x6c] sm:$0xf0] }
 0x23c   :  { %v517_v13 = vmul.f32 1.442695, %v516_v10  ;;  %v2228_v10 = vld [vmem:[#allocation7 + $0xd0] sm:$0xf0]  ;;  %822 = vmatpush.bf16.msrb.mxu3 %v2227_v9  ;;  %v2179_v9 = vor.u32 %v2728_v7, %v2178_v6  ;;  %v2130_v6 = vld [vmem:[#allocation7] sm:$0xf] }
 0x23d   :  { %v2716_v7 = vld [vmem:[#allocation7 + $0xc] sm:$0xf0] }
 0x23e   :  { %2873 = vpow2.f32 %v517_v13  ;;  %v2234_v13 = vld [vmem:[#allocation7 + $0xc8] sm:$0xf] }
 0x23f   :  { %v513_v15 = vpop.f32.mrf.mxu1 }
 0x240   :  { %v2741_v15 = vld [vmem:[#allocation7 + $0xd4] sm:$0xf0] }
 0x244   :  { %v2874_v22 = vpop.eup %2873 }
 0x245   :  { %v521_v23 = vsel %vm519_vm3, %v2874_v22, 1.0  ;;  %v520_v27 = vsel %vm519_vm3, 1.0, %v2874_v22  ;;  %v2231_v22 = vor.u32 %v2738_v8, %v2228_v10  ;;  %v2726_v8 = vld [vmem:[#allocation7 + $0x64] sm:$0xf]  ;;  %v2180_v10 = vld [vmem:[#allocation7 + $0x70] sm:$0xf0] }
 0x246   :  { %v523_v25 = vmul.f32 %v3311_v17, %v521_v23  ;;  %v2235_v23 = vor.u32 %v2741_v15, %v2234_v13  ;;  %v2186_v13 = vld [vmem:[#allocation7 + $0x68] sm:$0xf]  ;;  %v2729_v15 = vld [vmem:[#allocation7 + $0x74] sm:$0xf0] }
 0x247   :  { %835 = vmatpush.bf16.msra.mxu0 %v2231_v22  ;;  %v2183_v22 = vor.u32 %v2726_v8, %v2180_v10  ;;  %v2714_v8 = vld [vmem:[#allocation7 + $0x4] sm:$0xf]  ;;  %v2132_v10 = vld [vmem:[#allocation7 + $0x10] sm:$0xf0] }
 0x248   :  { %v524_v29 = vadd.f32 %v523_v25, %v520_v27  ;;  %v2739_v25 = vld [vmem:[#allocation7 + $0xcc] sm:$0xf]  ;;  %848 = vmatpush.bf16.msra.mxu1 %v2235_v23  ;;  %v2187_v23 = vor.u32 %v2729_v15, %v2186_v13  ;;  %v2138_v13 = vld [vmem:[#allocation7 + $0x8] sm:$0xf]  ;;  %v2717_v15 = vld [vmem:[#allocation7 + $0x14] sm:$0xf0] }
 0x24a   :  { %2875 = vrcp.f32 %v524_v29 }
 0x250   :  { %v2876_v36 = vpop.eup %2875 }
 0x251   :  { %v526_v39 = vmul.f32 %v2876_v36, %v520_v27  ;;  %v2236_v27 = vld [vmem:[#allocation7 + $0xd8] sm:$0xf0]  ;;  %v2212_v36 = vld [vmem:[#allocation7 + $0xb0] sm:$0xf0] }
 0x252   :  { %v2239_v29 = vor.u32 %v2739_v25, %v2236_v27  ;;  %v2727_v25 = vld [vmem:[#allocation7 + $0x6c] sm:$0xf]  ;;  %v2188_v27 = vld [vmem:[#allocation7 + $0x78] sm:$0xf0] }
 0x253   :  { %v527_v46 = vmul.f32 %v526_v39, %v435_v38  ;;  %v2218_v38 = vld [vmem:[#allocation7 + $0xa8] sm:$0xf]  ;;  %v2737_v39 = vld [vmem:[#allocation7 + $0xb4] sm:$0xf0] }
 0x254   :  { %861 = vmatpush.bf16.msra.mxu2 %v2239_v29  ;;  %v2191_v29 = vor.u32 %v2727_v25, %v2188_v27  ;;  %v2715_v25 = vld [vmem:[#allocation7 + $0xc] sm:$0xf]  ;;  %v2140_v27 = vld [vmem:[#allocation7 + $0x18] sm:$0xf0] }
 0x255   :  { %v528_v47 = vpack.c.bf16 %v527_v46, %v527_v46  ;;  %v2215_v46 = vor.u32 %v2734_v33, %v2212_v36  ;;  %v2722_v33 = vld [vmem:[#allocation7 + $0x44] sm:$0xf]  ;;  %v2164_v36 = vld [vmem:[#allocation7 + $0x50] sm:$0xf0] }
 0x257   :  { %601 = vmatmul.bf16.vlgmr.msrb.gmra.mxu2 %v528_v47  ;;  %v2219_v47 = vor.u32 %v2737_v39, %v2218_v38  ;;  %836 = vmatpush.bf16.msra.mxu0 %v2215_v46  ;;  %v2170_v38 = vld [vmem:[#allocation7 + $0x48] sm:$0xf]  ;;  %v2725_v39 = vld [vmem:[#allocation7 + $0x54] sm:$0xf0]  ;;  %v2167_v46 = vor.u32 %v2722_v33, %v2164_v36 }
 0x258   :  { %862 = vmatpush.bf16.msra.mxu2 %v2223_v52  ;;  %v2175_v52 = vor.u32 %v2723_v50, %v2172_v51  ;;  %v2867_v51 = vld [vmem:[%s3402_s7] ss:$0 sm:$0xff] }
 0x259   :  { %849 = vmatpush.bf16.msra.mxu1 %v2219_v47  ;;  %v2171_v47 = vor.u32 %v2725_v39, %v2170_v38 }
 0x25b   :  { %837 = vmatpush.bf16.msra.mxu0 %v2199_v1  ;;  %v2151_v1 = vor.u32 %v2718_v59, %v2148_v61  ;;  %v2753_v61 = vld [vmem:[#allocation8 + $0x38] sm:$0xff] }
 0x25d   :  { %850 = vmatpush.bf16.msra.mxu1 %v2203_v2  ;;  %v2155_v2 = vor.u32 %v2721_v63, %v2154_v62  ;;  %v2759_v62 = vld [vmem:[#allocation8 + $0x68] sm:$0xff]  ;;  %v2752_v63 = vld [vmem:[#allocation8 + $0x30] sm:$0xff] }
 0x25f   :  { %838 = vmatpush.bf16.msra.mxu0 %v2183_v22  ;;  %v2135_v22 = vor.u32 %v2714_v8, %v2132_v10  ;;  %v2748_v8 = vld [vmem:[#allocation8 + $0x10] sm:$0xff]  ;;  %v2747_v10 = vld [vmem:[#allocation8 + $0x8] sm:$0xff] }
 0x261   :  { %851 = vmatpush.bf16.msra.mxu1 %v2187_v23  ;;  %v2139_v23 = vor.u32 %v2717_v15, %v2138_v13  ;;  %v2746_v13 = vld [vmem:[#allocation8] sm:$0xff] }
 0x263   :  { %839 = vmatpush.bf16.msra.mxu0 %v2167_v46 }
 0x265   :  { %852 = vmatpush.bf16.msra.mxu1 %v2171_v47 }
 0x267   :  { %840 = vmatpush.bf16.msra.mxu0 %v2151_v1  ;;  %v2758_v1 = vld [vmem:[#allocation8 + $0x60] sm:$0xff] }
 0x269   :  { %853 = vmatpush.bf16.msra.mxu1 %v2155_v2  ;;  %v2751_v2 = vld [vmem:[#allocation8 + $0x28] sm:$0xff] }
 0x26b   :  { %841 = vmatpush.bf16.msra.mxu0 %v2135_v22 }
 0x26d   :  { %854 = vmatpush.bf16.msra.mxu1 %v2139_v23 }
 0x2da   :  { %v602_v49 = vpop.f32.mrf.mxu2 }
 0x2db   :  { %v3317_v3 = vadd.f32 %v602_v49, %v3176_v0  ;;  %v2210_v0 = vld [vmem:[#allocation7 + $0xa0] sm:$0xf]  ;;  %v2731_v49 = vld [vmem:[#allocation7 + $0x8c] sm:$0xf] }
 0x2dc   :  { %v2211_v34 = vor.u32 %v2736_v31, %v2210_v0  ;;  %v2162_v0 = vld [vmem:[#allocation7 + $0x40] sm:$0xf]  ;;  %v2724_v31 = vld [vmem:[#allocation7 + $0x4c] sm:$0xf0] }
 0x2dd   :  { %v608_v4 = vmul.f32 %v3317_v3, %v3317_v3 }
 0x2de   :  { %823 = vmatpush.bf16.msrb.mxu3 %v2211_v34  ;;  %v2163_v34 = vor.u32 %v2724_v31, %v2162_v0  ;;  %v2761_v0 = vld [vmem:[#allocation8 + $0x78] sm:$0xff] }
 0x2df   :  { %609 = vadd.xlane.f32.xlu0 %v608_v4  ;;  %v2204_v4 = vld [vmem:[#allocation7 + $0x98] sm:$0xf0]  ;;  %1030 = vmatpush.bf16.msrb.mxu0 %v2761_v0 }
 0x2e2   :  { %v604_v5 = vpop.f32.mrf.mxu2  ;;  %824 = vmatpush.bf16.msrb.mxu3 %v2195_v60  ;;  %v2147_v60 = vor.u32 %v2720_v58, %v2146_v57 }
 0x2e3   :  { %v2207_v5 = vor.u32 %v2731_v49, %v2204_v4  ;;  %v2719_v49 = vld [vmem:[#allocation7 + $0x2c] sm:$0xf]  ;;  %v2156_v4 = vld [vmem:[#allocation7 + $0x38] sm:$0xf0] }
 0x2e5   :  { %863 = vmatpush.bf16.msra.mxu2 %v2207_v5  ;;  %v2159_v5 = vor.u32 %v2719_v49, %v2156_v4  ;;  %v2757_v49 = vld [vmem:[#allocation8 + $0x58] sm:$0xff]  ;;  %v2750_v4 = vld [vmem:[#allocation8 + $0x20] sm:$0xff] }
 0x2e6   :  { %825 = vmatpush.bf16.msrb.mxu3 %v2179_v9  ;;  %v2131_v9 = vor.u32 %v2716_v7, %v2130_v6  ;;  %v2749_v6 = vld [vmem:[#allocation8 + $0x18] sm:$0xff]  ;;  %v2755_v7 = vld [vmem:[#allocation8 + $0x48] sm:$0xff] }
 0x2e9   :  { %864 = vmatpush.bf16.msra.mxu2 %v2191_v29  ;;  %v2143_v29 = vor.u32 %v2715_v25, %v2140_v27 }
 0x2ea   :  { %826 = vmatpush.bf16.msrb.mxu3 %v2163_v34 }
 0x2ed   :  { %865 = vmatpush.bf16.msra.mxu2 %v2175_v52 }
 0x2ee   :  { %827 = vmatpush.bf16.msrb.mxu3 %v2147_v60  ;;  %v2760_v60 = vld [vmem:[#allocation8 + $0x70] sm:$0xff] }
 0x2ef   :  { %1031 = vmatpush.bf16.msrb.mxu0 %v2760_v60 }
 0x2f1   :  { %866 = vmatpush.bf16.msra.mxu2 %v2159_v5  ;;  %v2756_v5 = vld [vmem:[#allocation8 + $0x50] sm:$0xff] }
 0x2f2   :  { %828 = vmatpush.bf16.msrb.mxu3 %v2131_v9  ;;  %v2754_v9 = vld [vmem:[#allocation8 + $0x40] sm:$0xff] }
 0x2f3   :  { %1032 = vmatpush.bf16.msrb.mxu0 %v2759_v62 }
 0x2f5   :  { %867 = vmatpush.bf16.msra.mxu2 %v2143_v29 }
 0x2f6   :  { %1017 = vmatpush.bf16.msra.mxu3 %v2753_v61 }
 0x2f7   :  { %1033 = vmatpush.bf16.msrb.mxu0 %v2758_v1  ;;  %v2784_v1 = vld [vmem:[#allocation3 + $0x170] sm:$0xf0] }
 0x2fa   :  { %1018 = vmatpush.bf16.msra.mxu3 %v2752_v63  ;;  %v2407_v63 = vld [vmem:[#allocation3 + $0x168] sm:$0xf] }
 0x2fb   :  { %1034 = vmatpush.bf16.msrb.mxu0 %v2757_v49  ;;  %v2408_v49 = vor.u32 %v2784_v1, %v2407_v63  ;;  %v2373_v1 = vld [vmem:[#allocation3 + $0x12c] sm:$0xf0] }
 0x2fd   :  { %1228 = vmatpush.bf16.msrb.mxu1 %v2408_v49  ;;  %v2776_v49 = vld [vmem:[#allocation3 + $0x130] sm:$0xf0] }
 0x2fe   :  { %1019 = vmatpush.bf16.msra.mxu3 %v2751_v2  ;;  %v2783_v2 = vld [vmem:[#allocation3 + $0x16c] sm:$0xf] }
 0x2ff   :  { %1035 = vmatpush.bf16.msrb.mxu0 %v2756_v5  ;;  %v2415_v5 = vld [vmem:[#allocation3 + $0x170] sm:$0xf] }
 0x302   :  { %1020 = vmatpush.bf16.msra.mxu3 %v2750_v4  ;;  %v2409_v4 = vld [vmem:[#allocation3 + $0x174] sm:$0xf0] }
 0x303   :  { %1036 = vmatpush.bf16.msrb.mxu0 %v2755_v7  ;;  %v2412_v7 = vor.u32 %v2783_v2, %v2409_v4  ;;  %v2379_v2 = vld [vmem:[#allocation3 + $0x128] sm:$0xf] }
 0x305   :  { %1241 = vmatpush.bf16.msrb.mxu2 %v2412_v7  ;;  %v2772_v7 = vld [vmem:[#allocation3 + $0x110] sm:$0xf0] }
 0x306   :  { %1021 = vmatpush.bf16.msra.mxu3 %v2749_v6  ;;  %v2785_v6 = vld [vmem:[#allocation3 + $0x178] sm:$0xf0] }
 0x307   :  { %1037 = vmatpush.bf16.msrb.mxu0 %v2754_v9 }
 0x30a   :  { %1022 = vmatpush.bf16.msra.mxu3 %v2748_v8  ;;  %v2416_v8 = vor.u32 %v2785_v6, %v2415_v5  ;;  %v2380_v5 = vor.u32 %v2776_v49, %v2379_v2  ;;  %v2359_v6 = vld [vmem:[#allocation3 + $0x108] sm:$0xf]  ;;  %v2764_v49 = vld [vmem:[#allocation3 + $0xd0] sm:$0xf0] }
 0x30b   :  { %v2331_v2 = vld [vmem:[#allocation3 + $0xc8] sm:$0xf] }
 0x30e   :  { %1023 = vmatpush.bf16.msra.mxu3 %v2747_v10 }
 0x312   :  { %1024 = vmatpush.bf16.msra.mxu3 %v2746_v13 }
 0x352   :  { %v610_v31 = vpop.xlane.xlu0 %609 }
 0x353   :  { %v611_v33 = vmul.f32 0.010416667, %v610_v31 }
 0x355   :  { %v612_v34 = vadd.f32 1e-05, %v611_v33 }
 0x357   :  { %2877 = vrsqrt.f32 %v612_v34  ;;  %vm619_vm5 = vweird.f32 %v612_v34 }
 0x35d   :  { %v2878_v36 = vpop.eup %2877 }
 0x35e   :  { %v614_v38 = vmul.f32 %v2878_v36, %v612_v34  ;;  %vm620_vm4 = vweird.f32 %v2878_v36 }
 0x35f   :  { %vm621_vm6 = vmor %vm619_vm5, %vm620_vm4 }
 0x360   :  { %v615_v39 = vmul.f32 %v2878_v36, %v614_v38 }
 0x362   :  { %v616_v46 = vmul.f32 0.5, %v615_v39 }
 0x364   :  { %v617_v47 = vsub.f32 1.5, %v616_v46 }
 0x366   :  { %v618_v50 = vmul.f32 %v2878_v36, %v617_v47 }
 0x368   :  { %v622_v52 = vsel %vm621_vm6, %v2878_v36, %v618_v50 }
 0x369   :  { %v623_v57 = vmul.f32 %v622_v52, %v3317_v3 }
 0x36b   :  { %v627_v58 = vmul.f32 %v2867_v51, %v623_v57 }
 0x36d   :  { %v628_v59 = vpack.c.bf16 %v627_v58, %v627_v58 }
 0x36f   :  { %829 = vmatmul.bf16.vlgmr.msrb.gmra.mxu3 %v628_v59  ;;  %842 = vmatmul.bf16.vlgmr.msra.gmra.mxu0 %v628_v59 }
 0x370   :  { %855 = vmatmul.bf16.vlgmr.msra.gmra.mxu1 %v628_v59  ;;  %868 = vmatmul.bf16.vlgmr.msra.gmra.mxu2 %v628_v59 }
 0x371   :  { %1267 = vmatpush.msra.mxu0 %v3180_v11  ;;  %1254 = vmatpush.bf16.msrb.mxu3 %v2416_v8  ;;  %v2771_v8 = vld [vmem:[#allocation3 + $0x10c] sm:$0xf] }
 0x373   :  { %1268 = vmatpush.msra.mxu0 %v3182_v12 }
 0x375   :  { %1269 = vmatpush.msra.mxu0 %v3186_v14 }
 0x377   :  { %1270 = vmatpush.msra.mxu0 %v3190_v16 }
 0x379   :  { %1271 = vmatpush.msra.mxu0 %v3194_v18 }
 0x37b   :  { %1272 = vmatpush.msra.mxu0 %v3198_v19 }
 0x37d   :  { %1273 = vmatpush.msra.mxu0 %v3202_v20 }
 0x37f   :  { %1274 = vmatpush.msra.mxu0 %v3206_v21 }
 0x381   :  { %1275 = vmatpush.msra.mxu0 %v3210_v24 }
 0x383   :  { %1276 = vmatpush.msra.mxu0 %v3214_v26 }
 0x385   :  { %1277 = vmatpush.msra.mxu0 %v3218_v28 }
 0x387   :  { %1278 = vmatpush.msra.mxu0 %v3222_v30 }
 0x389   :  { %1279 = vmatpush.msra.mxu0 %v3226_v32 }
 0x38b   :  { %1280 = vmatpush.msra.mxu0 %v3233_v35 }
 0x38d   :  { %1281 = vmatpush.msra.mxu0 %v3238_v37 }
 0x38f   :  { %1282 = vmatpush.msra.mxu0 %v3244_v40 }
 0x3ec   :  { %v843_v15 = vpop.f32.mrf.mxu0 }
 0x3ed   :  { %v874_v22 = vsub.f32 0.0, %v843_v15  ;;  %v856_v23 = vpop.f32.mrf.mxu1 }
 0x3ef   :  { %v877_v25 = vmul.f32 1.442695, %v874_v22 }
 0x3f1   :  { %2879 = vpow2.f32 %v877_v25 }
 0x3f2   :  { %v830_v27 = vpop.f32.mrf.mxu3 }
 0x3f3   :  { %v873_v29 = vsub.f32 0.0, %v830_v27  ;;  %v869_v0 = vpop.f32.mrf.mxu2 }
 0x3f4   :  { %v845_v31 = vpop.f32.mrf.mxu0 }
 0x3f5   :  { %v875_v33 = vmul.f32 1.442695, %v873_v29  ;;  %v858_v34 = vpop.f32.mrf.mxu1  ;;  %v2781_v29 = vld [vmem:[#allocation3 + $0x158] sm:$0xf0] }
 0x3f6   :  { %v2403_v34 = vld [vmem:[#allocation3 + $0x158] sm:$0xf] }
 0x3f7   :  { %v2880_v36 = vpop.eup %2879  ;;  %2881 = vpow2.f32 %v875_v33  ;;  %v2397_v33 = vld [vmem:[#allocation3 + $0x15c] sm:$0xf0] }
 0x3f8   :  { %v880_v38 = vadd.f32 1.0, %v2880_v36  ;;  %v2782_v36 = vld [vmem:[#allocation3 + $0x160] sm:$0xf0] }
 0x3fa   :  { %2883 = vrcp.f32 %v880_v38  ;;  %v832_v39 = vpop.f32.mrf.mxu3 }
 0x3fb   :  { %v871_v46 = vpop.f32.mrf.mxu2  ;;  %v2404_v39 = vor.u32 %v2782_v36, %v2403_v34  ;;  %v2355_v34 = vld [vmem:[#allocation3 + $0xf8] sm:$0xf]  ;;  %v2770_v36 = vld [vmem:[#allocation3 + $0x100] sm:$0xf0] }
 0x3fc   :  { %v2383_v46 = vld [vmem:[#allocation3 + $0x138] sm:$0xf] }
 0x3fd   :  { %v2882_v47 = vpop.eup %2881  ;;  %1255 = vmatpush.bf16.msrb.mxu3 %v2404_v39  ;;  %v2356_v39 = vor.u32 %v2770_v36, %v2355_v34 }
 0x3fe   :  { %v879_v50 = vadd.f32 1.0, %v2882_v47  ;;  %v2777_v47 = vld [vmem:[#allocation3 + $0x13c] sm:$0xf] }
 0x400   :  { %v2884_v51 = vpop.eup %2883  ;;  %2885 = vrcp.f32 %v879_v50 }
 0x401   :  { %v884_v52 = vmul.f32 %v2884_v51, %v843_v15  ;;  %v2385_v51 = vld [vmem:[#allocation3 + $0x144] sm:$0xf0] }
 0x403   :  { %v886_v57 = vmul.f32 %v884_v52, %v869_v0  ;;  %v2780_v0 = vld [vmem:[#allocation3 + $0x154] sm:$0xf]  ;;  %v2391_v52 = vld [vmem:[#allocation3 + $0x140] sm:$0xf] }
 0x404   :  { %v2400_v38 = vor.u32 %v2780_v0, %v2397_v33  ;;  %v2768_v0 = vld [vmem:[#allocation3 + $0xf4] sm:$0xf]  ;;  %v2349_v33 = vld [vmem:[#allocation3 + $0xfc] sm:$0xf0] }
 0x405   :  { %v888_v58 = vpack.c.bf16 %v886_v57, %v886_v57  ;;  %v2779_v57 = vld [vmem:[#allocation3 + $0x148] sm:$0xf0] }
 0x406   :  { %v2886_v59 = vpop.eup %2885  ;;  %1242 = vmatpush.bf16.msrb.mxu2 %v2400_v38  ;;  %v2352_v38 = vor.u32 %v2768_v0, %v2349_v33 }
 0x407   :  { %v883_v60 = vmul.f32 %v2886_v59, %v830_v27  ;;  %1038 = vmatmul.bf16.vlgmr.msrb.gmra.mxu0 %v888_v58  ;;  %v2395_v27 = vld [vmem:[#allocation3 + $0x150] sm:$0xf]  ;;  %v2388_v58 = vor.u32 %v2777_v47, %v2385_v51  ;;  %v2392_v59 = vor.u32 %v2779_v57, %v2391_v52  ;;  %v2765_v47 = vld [vmem:[#allocation3 + $0xdc] sm:$0xf]  ;;  %v2337_v51 = vld [vmem:[#allocation3 + $0xe4] sm:$0xf0] }
 0x408   :  { %v2396_v31 = vor.u32 %v2781_v29, %v2395_v27  ;;  %v2347_v27 = vld [vmem:[#allocation3 + $0xf0] sm:$0xf]  ;;  %v2769_v29 = vld [vmem:[#allocation3 + $0xf8] sm:$0xf0]  ;;  %v2343_v52 = vld [vmem:[#allocation3 + $0xe0] sm:$0xf] }
 0x409   :  { %v885_v61 = vmul.f32 %v883_v60, %v856_v23  ;;  %1256 = vmatpush.bf16.msrb.mxu3 %v2392_v59  ;;  %v2371_v60 = vld [vmem:[#allocation3 + $0x120] sm:$0xf]  ;;  %v2767_v57 = vld [vmem:[#allocation3 + $0xe8] sm:$0xf0] }
 0x40a   :  { %1229 = vmatpush.bf16.msrb.mxu1 %v2396_v31  ;;  %1243 = vmatpush.bf16.msrb.mxu2 %v2388_v58  ;;  %v2348_v31 = vor.u32 %v2769_v29, %v2347_v27  ;;  %v2340_v58 = vor.u32 %v2765_v47, %v2337_v51  ;;  %v2344_v59 = vor.u32 %v2767_v57, %v2343_v52  ;;  %v2786_v27 = vld [vmem:[#allocation5 + $0x40] sm:$0xff] }
 0x40b   :  { %v887_v62 = vpack.c.bf16 %v885_v61, %v885_v61  ;;  %v2775_v61 = vld [vmem:[#allocation3 + $0x128] sm:$0xf0] }
 0x40c   :  { %v2372_v63 = vor.u32 %v2775_v61, %v2371_v60  ;;  %v2323_v60 = vld [vmem:[#allocation3 + $0xc0] sm:$0xf]  ;;  %v2763_v61 = vld [vmem:[#allocation3 + $0xc8] sm:$0xf0] }
 0x40d   :  { %1025 = vmatmul.bf16.vlgmr.msra.gmra.mxu3 %v887_v62  ;;  %v2774_v62 = vld [vmem:[#allocation3 + $0x124] sm:$0xf] }
 0x40e   :  { %v2376_v4 = vor.u32 %v2774_v62, %v2373_v1  ;;  %1257 = vmatpush.bf16.msrb.mxu3 %v2380_v5  ;;  %v2762_v62 = vld [vmem:[#allocation3 + $0xc4] sm:$0xf]  ;;  %v2325_v1 = vld [vmem:[#allocation3 + $0xcc] sm:$0xf0]  ;;  %v2332_v5 = vor.u32 %v2764_v49, %v2331_v2  ;;  %v2566_v2 = vld [vmem:[#allocation7 + $0x1f0] sm:$0xf0] }
 0x40f   :  { %v2825_v49 = vld [vmem:[#allocation7 + $0x1f4] sm:$0xf0] }
 0x410   :  { %1244 = vmatpush.bf16.msrb.mxu2 %v2376_v4  ;;  %v2328_v4 = vor.u32 %v2762_v62, %v2325_v1  ;;  %v2824_v62 = vld [vmem:[#allocation7 + $0x1ec] sm:$0xf0] }
 0x484   :  { %v1039_v9 = vpop.f32.mrf.mxu0 }
 0x48c   :  { %v1041_v10 = vpop.f32.mrf.mxu0 }
 0x48d   :  { %v2361_v10 = vld [vmem:[#allocation3 + $0x114] sm:$0xf0] }
 0x490   :  { %v1026_v13 = vpop.f32.mrf.mxu3 }
 0x491   :  { %v1040_v15 = vadd.f32 %v1039_v9, %v1026_v13  ;;  %v2360_v9 = vor.u32 %v2772_v7, %v2359_v6  ;;  %v2367_v13 = vld [vmem:[#allocation3 + $0x110] sm:$0xf] }
 0x493   :  { %v3342_v22 = vadd.f32 %v1040_v15, %v3317_v3  ;;  %v2778_v3 = vld [vmem:[#allocation3 + $0x140] sm:$0xf0]  ;;  %v2773_v15 = vld [vmem:[#allocation3 + $0x118] sm:$0xf0] }
 0x494   :  { %v2384_v50 = vor.u32 %v2778_v3, %v2383_v46  ;;  %v2335_v46 = vld [vmem:[#allocation3 + $0xd8] sm:$0xf]  ;;  %v2766_v3 = vld [vmem:[#allocation3 + $0xe0] sm:$0xf0] }
 0x495   :  { %v1046_v23 = vmul.f32 %v3342_v22, %v3342_v22 }
 0x496   :  { %1230 = vmatpush.bf16.msrb.mxu1 %v2384_v50  ;;  %v2336_v50 = vor.u32 %v2766_v3, %v2335_v46 }
 0x497   :  { %1047 = vadd.xlane.f32.xlu1 %v1046_v23  ;;  %v2364_v23 = vor.u32 %v2771_v8, %v2361_v10  ;;  %v2791_v10 = vld [vmem:[#allocation5 + $0x68] sm:$0xff] }
 0x498   :  { %v1028_v25 = vpop.f32.mrf.mxu3 }
 0x499   :  { %v2368_v25 = vor.u32 %v2773_v15, %v2367_v13  ;;  %1245 = vmatpush.bf16.msrb.mxu2 %v2364_v23  ;;  %v2790_v13 = vld [vmem:[#allocation5 + $0x60] sm:$0xff]  ;;  %v2789_v15 = vld [vmem:[#allocation5 + $0x58] sm:$0xff]  ;;  %v2788_v23 = vld [vmem:[#allocation5 + $0x50] sm:$0xff] }
 0x49a   :  { %1231 = vmatpush.bf16.msrb.mxu1 %v2372_v63  ;;  %v2324_v63 = vor.u32 %v2763_v61, %v2323_v60  ;;  %v2564_v61 = vld [vmem:[#allocation7 + $0x1e0] sm:$0xf] }
 0x49b   :  { %1258 = vmatpush.bf16.msrb.mxu3 %v2368_v25  ;;  %v2787_v25 = vld [vmem:[#allocation5 + $0x48] sm:$0xff]  ;;  %v2565_v1 = vor.u32 %v2824_v62, %v2564_v61  ;;  %v2484_v61 = vld [vmem:[#allocation7 + $0x140] sm:$0xf]  ;;  %v2804_v62 = vld [vmem:[#allocation7 + $0x14c] sm:$0xf0] }
 0x49d   :  { %1246 = vmatpush.bf16.msrb.mxu2 %v2352_v38  ;;  %1636 = vmatpush.bf16.msrb.mxu0 %v2565_v1  ;;  %v2485_v1 = vor.u32 %v2804_v62, %v2484_v61  ;;  %v2835_v61 = vld [vmem:[#allocation8 + $0xc8] sm:$0xff]  ;;  %v2826_v62 = vld [vmem:[#allocation8 + $0x80] sm:$0xff] }
 0x49e   :  { %1232 = vmatpush.bf16.msrb.mxu1 %v2360_v9  ;;  %v2792_v9 = vld [vmem:[#allocation5 + $0x70] sm:$0xff] }
 0x49f   :  { %1259 = vmatpush.bf16.msrb.mxu3 %v2356_v39 }
 0x4a1   :  { %1247 = vmatpush.bf16.msrb.mxu2 %v2340_v58 }
 0x4a2   :  { %1233 = vmatpush.bf16.msrb.mxu1 %v2348_v31 }
 0x4a3   :  { %1260 = vmatpush.bf16.msrb.mxu3 %v2344_v59 }
 0x4a5   :  { %1248 = vmatpush.bf16.msrb.mxu2 %v2328_v4 }
 0x4a6   :  { %1234 = vmatpush.bf16.msrb.mxu1 %v2336_v50 }
 0x4a7   :  { %1261 = vmatpush.bf16.msrb.mxu3 %v2332_v5 }
 0x4a9   :  { %1315 = vmatpush.bf16.msra.mxu2 %v3251_v41 }
 0x4aa   :  { %1235 = vmatpush.bf16.msrb.mxu1 %v2324_v63  ;;  %v2822_v63 = vld [vmem:[#allocation7 + $0x1e4] sm:$0xf] }
 0x4ab   :  { %v2569_v4 = vor.u32 %v2822_v63, %v2566_v2  ;;  %v2802_v63 = vld [vmem:[#allocation7 + $0x144] sm:$0xf]  ;;  %v2486_v2 = vld [vmem:[#allocation7 + $0x150] sm:$0xf0] }
 0x4ad   :  { %1316 = vmatpush.bf16.msra.mxu2 %v3257_v42 }
 0x4ae   :  { %1290 = vmatpush.msra.mxu1 %v3180_v11 }
 0x4b0   :  { %1291 = vmatpush.msra.mxu1 %v3182_v12 }
 0x4b1   :  { %1317 = vmatpush.bf16.msra.mxu2 %v3263_v43 }
 0x4b2   :  { %1292 = vmatpush.msra.mxu1 %v3186_v14 }
 0x4b4   :  { %1293 = vmatpush.msra.mxu1 %v3190_v16 }
 0x4b5   :  { %1318 = vmatpush.bf16.msra.mxu2 %v3269_v44 }
 0x4b6   :  { %1294 = vmatpush.msra.mxu1 %v3194_v18 }
 0x4b8   :  { %1295 = vmatpush.msra.mxu1 %v3198_v19 }
 0x4b9   :  { %1319 = vmatpush.bf16.msra.mxu2 %v3275_v45 }
 0x4ba   :  { %1296 = vmatpush.msra.mxu1 %v3202_v20  ;;  %v2868_v20 = vld [vmem:[%s3399_s4 + $0x1] ss:$0 sm:$0xff] }
 0x4bc   :  { %1297 = vmatpush.msra.mxu1 %v3206_v21 }
 0x4bd   :  { %1320 = vmatpush.bf16.msra.mxu2 %v3281_v48 }
 0x4be   :  { %1298 = vmatpush.msra.mxu1 %v3210_v24 }
 0x4c0   :  { %1299 = vmatpush.msra.mxu1 %v3214_v26 }
 0x4c1   :  { %1321 = vmatpush.bf16.msra.mxu2 %v3287_v53 }
 0x4c2   :  { %1300 = vmatpush.msra.mxu1 %v3218_v28 }
 0x4c4   :  { %1301 = vmatpush.msra.mxu1 %v3222_v30 }
 0x4c5   :  { %1322 = vmatpush.bf16.msra.mxu2 %v3293_v54 }
 0x4c6   :  { %1302 = vmatpush.msra.mxu1 %v3226_v32 }
 0x4c8   :  { %1303 = vmatpush.msra.mxu1 %v3233_v35 }
 0x4ca   :  { %1304 = vmatpush.msra.mxu1 %v3238_v37 }
 0x4cc   :  { %1305 = vmatpush.msra.mxu1 %v3244_v40  ;;  %v2793_v40 = vld [vmem:[#allocation5 + $0x78] sm:$0xff] }
 0x4cd   :  { %1406 = vmatpush.bf16.msra.mxu3 %v2793_v40  ;;  %v2542_v40 = vld [vmem:[#allocation7 + $0x1b8] sm:$0xf0] }
 0x4d1   :  { %1407 = vmatpush.bf16.msra.mxu3 %v2792_v9 }
 0x4d5   :  { %1408 = vmatpush.bf16.msra.mxu3 %v2791_v10  ;;  %v2516_v10 = vld [vmem:[#allocation7 + $0x180] sm:$0xf] }
 0x4d9   :  { %1409 = vmatpush.bf16.msra.mxu3 %v2790_v13  ;;  %v2812_v13 = vld [vmem:[#allocation7 + $0x18c] sm:$0xf0] }
 0x4dd   :  { %1410 = vmatpush.bf16.msra.mxu3 %v2789_v15  ;;  %v2810_v15 = vld [vmem:[#allocation7 + $0x184] sm:$0xf] }
 0x4e1   :  { %1411 = vmatpush.bf16.msra.mxu3 %v2788_v23  ;;  %v2517_v23 = vor.u32 %v2812_v13, %v2516_v10 }
 0x4e5   :  { %1412 = vmatpush.bf16.msra.mxu3 %v2787_v25  ;;  %v2518_v25 = vld [vmem:[#allocation7 + $0x190] sm:$0xf0] }
 0x4e9   :  { %1413 = vmatpush.bf16.msra.mxu3 %v2786_v27  ;;  %v2524_v27 = vld [vmem:[#allocation7 + $0x188] sm:$0xf] }
 0x50a   :  { %v1048_v6 = vpop.xlane.xlu1 %1047 }
 0x50b   :  { %v1049_v7 = vmul.f32 0.010416667, %v1048_v6  ;;  %v2823_v6 = vld [vmem:[#allocation7 + $0x1ec] sm:$0xf] }
 0x50d   :  { %v1050_v8 = vadd.f32 1e-05, %v1049_v7  ;;  %v2574_v7 = vld [vmem:[#allocation7 + $0x1f8] sm:$0xf0] }
 0x50f   :  { %2887 = vrsqrt.f32 %v1050_v8  ;;  %vm1057_vm8 = vweird.f32 %v1050_v8 }
 0x515   :  { %v2888_v11 = vpop.eup %2887 }
 0x516   :  { %v1052_v12 = vmul.f32 %v2888_v11, %v1050_v8  ;;  %vm1058_vm7 = vweird.f32 %v2888_v11 }
 0x517   :  { %vm1059_vm9 = vmor %vm1057_vm8, %vm1058_vm7 }
 0x518   :  { %v1053_v14 = vmul.f32 %v2888_v11, %v1052_v12 }
 0x51a   :  { %v1054_v16 = vmul.f32 0.5, %v1053_v14  ;;  %v2548_v14 = vld [vmem:[#allocation7 + $0x1c0] sm:$0xf] }
 0x51c   :  { %v1055_v18 = vsub.f32 1.5, %v1054_v16  ;;  %v2820_v16 = vld [vmem:[#allocation7 + $0x1cc] sm:$0xf0] }
 0x51e   :  { %v1056_v19 = vmul.f32 %v2888_v11, %v1055_v18  ;;  %v2818_v18 = vld [vmem:[#allocation7 + $0x1c4] sm:$0xf] }
 0x520   :  { %v1060_v21 = vsel %vm1059_vm9, %v2888_v11, %v1056_v19  ;;  %v2549_v19 = vor.u32 %v2820_v16, %v2548_v14  ;;  %v2470_v16 = vld [vmem:[#allocation7 + $0x130] sm:$0xf0] }
 0x521   :  { %v1061_v24 = vmul.f32 %v1060_v21, %v3342_v22  ;;  %v2556_v21 = vld [vmem:[#allocation7 + $0x1c8] sm:$0xf] }
 0x522   :  { %1637 = vmatpush.bf16.msrb.mxu0 %v2549_v19  ;;  %v2801_v19 = vld [vmem:[#allocation7 + $0x134] sm:$0xf0] }
 0x523   :  { %v1065_v26 = vmul.f32 %v2868_v20, %v1061_v24  ;;  %v2550_v20 = vld [vmem:[#allocation7 + $0x1d0] sm:$0xf0]  ;;  %v2821_v24 = vld [vmem:[#allocation7 + $0x1d4] sm:$0xf0] }
 0x525   :  { %v1066_v28 = vpack.c.bf16 %v1065_v26, %v1065_v26  ;;  %v2553_v26 = vor.u32 %v2818_v18, %v2550_v20  ;;  %v2476_v18 = vld [vmem:[#allocation7 + $0x128] sm:$0xf] }
 0x527   :  { %1236 = vmatmul.bf16.vlgmr.msrb.gmra.mxu1 %v1066_v28  ;;  %1249 = vmatmul.bf16.vlgmr.msrb.gmra.mxu2 %v1066_v28 }
 0x528   :  { %1262 = vmatmul.bf16.vlgmr.msrb.gmra.mxu3 %v1066_v28  ;;  %1649 = vmatpush.bf16.msrb.mxu1 %v2569_v4  ;;  %v2557_v28 = vor.u32 %v2821_v24, %v2556_v21  ;;  %v2489_v4 = vor.u32 %v2802_v63, %v2486_v2  ;;  %v2477_v21 = vor.u32 %v2801_v19, %v2476_v18  ;;  %v2799_v24 = vld [vmem:[#allocation7 + $0x12c] sm:$0xf]  ;;  %v2834_v63 = vld [vmem:[#allocation8 + $0xc0] sm:$0xff] }
 0x52c   :  { %1650 = vmatpush.bf16.msrb.mxu1 %v2553_v26  ;;  %v2478_v26 = vld [vmem:[#allocation7 + $0x138] sm:$0xf0] }
 0x5a4   :  { %v1237_v30 = vpop.f32.mrf.mxu1 }
 0x5a5   :  { %1283 = vmatmul.f32.vlgmr.msra.gmra.mxu0 %v1237_v30  ;;  %v1287_v45 = vmul.f32 %v3299_v55, %v1237_v30  ;;  %v2819_v30 = vld [vmem:[#allocation7 + $0x1cc] sm:$0xf] }
 0x5aa   :  { %v1250_v32 = vpop.f32.mrf.mxu2 }
 0x5ab   :  { %v1263_v41 = vpop.f32.mrf.mxu3 }
 0x5ac   :  { %1306 = vmatmul.f32.vlgmr.msra.gmra.mxu1 %v1263_v41  ;;  %v1239_v42 = vpop.f32.mrf.mxu1  ;;  %v1310_v51 = vmul.f32 %v3299_v55, %v1263_v41 }
 0x5ad   :  { %v2816_v42 = vld [vmem:[#allocation7 + $0x1ac] sm:$0xf0] }
 0x5b2   :  { %v1252_v43 = vpop.f32.mrf.mxu2 }
 0x5b3   :  { %v1265_v44 = vpop.f32.mrf.mxu3  ;;  %v2814_v43 = vld [vmem:[#allocation7 + $0x1a4] sm:$0xf] }
 0x622   :  { %v1284_v35 = vpop.f32.mrf.mxu0 }
 0x623   :  { %v1288_v37 = vmul.f32 %v3304_v56, %v1284_v35  ;;  %v2534_v35 = vld [vmem:[#allocation7 + $0x1b0] sm:$0xf0] }
 0x625   :  { %v1289_v48 = vadd.f32 %v1288_v37, %v1287_v45  ;;  %v2540_v45 = vld [vmem:[#allocation7 + $0x1a8] sm:$0xf]  ;;  %v2817_v37 = vld [vmem:[#allocation7 + $0x1b4] sm:$0xf0] }
 0x627   :  { %v1313_v53 = vmul.f32 %v1289_v48, %v1250_v32  ;;  %v2558_v32 = vld [vmem:[#allocation7 + $0x1d8] sm:$0xf0]  ;;  %v2537_v48 = vor.u32 %v2814_v43, %v2534_v35  ;;  %v2460_v43 = vld [vmem:[#allocation7 + $0x108] sm:$0xf] }
 0x628   :  { %v2561_v41 = vor.u32 %v2819_v30, %v2558_v32  ;;  %v2452_v30 = vld [vmem:[#allocation7 + $0x100] sm:$0xf]  ;;  %v2796_v32 = vld [vmem:[#allocation7 + $0x10c] sm:$0xf0] }
 0x629   :  { %v1314_v54 = vpack.c.bf16 %v1313_v53, %v1313_v53  ;;  %v1307_v47 = vpop.f32.mrf.mxu1  ;;  %v2541_v53 = vor.u32 %v2817_v37, %v2540_v45  ;;  %1651 = vmatpush.bf16.msrb.mxu1 %v2537_v48  ;;  %v2795_v37 = vld [vmem:[#allocation7 + $0x10c] sm:$0xf]  ;;  %v2462_v48 = vld [vmem:[#allocation7 + $0x118] sm:$0xf0] }
 0x62a   :  { %v1311_v50 = vmul.f32 %v3304_v56, %v1307_v47  ;;  %v2577_v56 = vor.u32 %v2823_v6, %v2574_v7  ;;  %v2502_v47 = vld [vmem:[#allocation7 + $0x170] sm:$0xf0]  ;;  %v2803_v6 = vld [vmem:[#allocation7 + $0x14c] sm:$0xf]  ;;  %v2494_v7 = vld [vmem:[#allocation7 + $0x158] sm:$0xf0] }
 0x62b   :  { %1323 = vmatmul.bf16.vlgmr.msra.gmra.mxu2 %v1314_v54  ;;  %v2815_v54 = vld [vmem:[#allocation7 + $0x1ac] sm:$0xf] }
 0x62c   :  { %v1312_v57 = vadd.f32 %v1311_v50, %v1310_v51  ;;  %1675 = vmatpush.bf16.msrb.mxu3 %v2577_v56  ;;  %v2545_v9 = vor.u32 %v2815_v54, %v2542_v40  ;;  %v2508_v50 = vld [vmem:[#allocation7 + $0x168] sm:$0xf]  ;;  %v2809_v51 = vld [vmem:[#allocation7 + $0x174] sm:$0xf0]  ;;  %v2497_v56 = vor.u32 %v2803_v6, %v2494_v7 }
 0x62d   :  { %v2833_v54 = vld [vmem:[#allocation8 + $0xb8] sm:$0xff] }
 0x62e   :  { %v2841_v40 = vld [vmem:[#allocation8 + $0xf8] sm:$0xff] }
 0x630   :  { %1676 = vmatpush.bf16.msrb.mxu3 %v2561_v41  ;;  %v2794_v41 = vld [vmem:[#allocation7 + $0x104] sm:$0xf] }
 0x634   :  { %1677 = vmatpush.bf16.msrb.mxu3 %v2545_v9 }
 0x6ae   :  { %v1324_v29 = vpop.f32.mrf.mxu2 }
 0x6af   :  { %v1328_v0 = vand.u32 2147483647, %v1324_v29  ;;  %vm1332_vm10 = vcmp.ge.f32.partialorder %v1324_v29, 0.0  ;;  %v2813_v29 = vld [vmem:[#allocation7 + $0x194] sm:$0xf0] }
 0x6b1   :  { %v1329_v31 = vsub.f32 0.0, %v1328_v0  ;;  %v2521_v0 = vor.u32 %v2810_v15, %v2518_v25 }
 0x6b3   :  { %v1330_v33 = vmul.f32 1.442695, %v1329_v31  ;;  %v2525_v31 = vor.u32 %v2813_v29, %v2524_v27  ;;  %1652 = vmatpush.bf16.msrb.mxu1 %v2521_v0 }
 0x6b5   :  { %2889 = vpow2.f32 %v1330_v33  ;;  %v2811_v33 = vld [vmem:[#allocation7 + $0x18c] sm:$0xf] }
 0x6b6   :  { %v1326_v34 = vpop.f32.mrf.mxu2 }
 0x6b7   :  { %v2526_v34 = vld [vmem:[#allocation7 + $0x198] sm:$0xf0] }
 0x6bb   :  { %v2890_v36 = vpop.eup %2889 }
 0x6bc   :  { %v1334_v38 = vsel %vm1332_vm10, %v2890_v36, 1.0  ;;  %v1333_v46 = vsel %vm1332_vm10, 1.0, %v2890_v36  ;;  %v2529_v36 = vor.u32 %v2811_v33, %v2526_v34 }
 0x6bd   :  { %v1335_v39 = vmul.f32 %v1334_v38, %v3311_v17  ;;  %v2572_v17 = vld [vmem:[#allocation7 + $0x1e8] sm:$0xf]  ;;  %v2500_v38 = vld [vmem:[#allocation7 + $0x160] sm:$0xf] }
 0x6be   :  { %v2573_v5 = vor.u32 %v2825_v49, %v2572_v17  ;;  %1678 = vmatpush.bf16.msrb.mxu3 %v2529_v36  ;;  %v2492_v17 = vld [vmem:[#allocation7 + $0x148] sm:$0xf]  ;;  %v2805_v49 = vld [vmem:[#allocation7 + $0x154] sm:$0xf0] }
 0x6bf   :  { %v1336_v3 = vadd.f32 %v1335_v39, %v1333_v46  ;;  %v2808_v39 = vld [vmem:[#allocation7 + $0x16c] sm:$0xf0] }
 0x6c0   :  { %1662 = vmatpush.bf16.msrb.mxu2 %v2573_v5  ;;  %v2493_v5 = vor.u32 %v2805_v49, %v2492_v17 }
 0x6c1   :  { %2891 = vrcp.f32 %v1336_v3  ;;  %v2501_v3 = vor.u32 %v2808_v39, %v2500_v38  ;;  %v2832_v39 = vld [vmem:[#allocation8 + $0xb0] sm:$0xff] }
 0x6c4   :  { %1663 = vmatpush.bf16.msrb.mxu2 %v2557_v28  ;;  %v2481_v28 = vor.u32 %v2799_v24, %v2478_v26 }
 0x6c7   :  { %v2892_v52 = vpop.eup %2891 }
 0x6c8   :  { %v1338_v58 = vmul.f32 %v2892_v52, %v1333_v46  ;;  %1664 = vmatpush.bf16.msrb.mxu2 %v2541_v53  ;;  %v2806_v46 = vld [vmem:[#allocation7 + $0x164] sm:$0xf]  ;;  %v2465_v53 = vor.u32 %v2795_v37, %v2462_v48 }
 0x6c9   :  { %v2505_v52 = vor.u32 %v2806_v46, %v2502_v47  ;;  %v2840_v46 = vld [vmem:[#allocation8 + $0xf0] sm:$0xff]  ;;  %v2839_v47 = vld [vmem:[#allocation8 + $0xe8] sm:$0xff] }
 0x6ca   :  { %v1339_v59 = vmul.f32 %v1338_v58, %v1312_v57  ;;  %v2509_v57 = vor.u32 %v2809_v51, %v2508_v50  ;;  %v2807_v58 = vld [vmem:[#allocation7 + $0x16c] sm:$0xf]  ;;  %v2830_v50 = vld [vmem:[#allocation8 + $0xa0] sm:$0xff] }
 0x6cb   :  { %1653 = vmatpush.bf16.msrb.mxu1 %v2505_v52  ;;  %v2838_v51 = vld [vmem:[#allocation8 + $0xe0] sm:$0xff]  ;;  %v2829_v52 = vld [vmem:[#allocation8 + $0x98] sm:$0xff] }
 0x6cc   :  { %v1340_v60 = vpack.c.bf16 %v1339_v59, %v1339_v59  ;;  %1665 = vmatpush.bf16.msrb.mxu2 %v2525_v31  ;;  %v2510_v59 = vld [vmem:[#allocation7 + $0x178] sm:$0xf0]  ;;  %v2869_v31 = vld [vmem:[%s3402_s7 + $0x1] ss:$0 sm:$0xff] }
 0x6ce   :  { %1414 = vmatmul.bf16.vlgmr.msra.gmra.mxu3 %v1340_v60  ;;  %v2513_v60 = vor.u32 %v2807_v58, %v2510_v59  ;;  %v2828_v58 = vld [vmem:[#allocation8 + $0x90] sm:$0xff] }
 0x6cf   :  { %1654 = vmatpush.bf16.msrb.mxu1 %v2489_v4  ;;  %v2836_v59 = vld [vmem:[#allocation8 + $0xd0] sm:$0xff] }
 0x6d0   :  { %1666 = vmatpush.bf16.msrb.mxu2 %v2509_v57  ;;  %1679 = vmatpush.bf16.msrb.mxu3 %v2513_v60  ;;  %v2837_v57 = vld [vmem:[#allocation8 + $0xd8] sm:$0xff]  ;;  %v2827_v60 = vld [vmem:[#allocation8 + $0x88] sm:$0xff] }
 0x6d4   :  { %1667 = vmatpush.bf16.msrb.mxu2 %v2493_v5  ;;  %1680 = vmatpush.bf16.msrb.mxu3 %v2497_v56 }
 0x6d8   :  { %1668 = vmatpush.bf16.msrb.mxu2 %v2477_v21  ;;  %1681 = vmatpush.bf16.msrb.mxu3 %v2481_v28 }
 0x6dc   :  { %1682 = vmatpush.bf16.msrb.mxu3 %v2465_v53  ;;  %v2848_v53 = vld [vmem:[#allocation11 + $0x30] sm:$0xff] }
 0x751   :  { %v1415_v55 = vpop.f32.mrf.mxu3 }
 0x752   :  { %v3380_v8 = vadd.f32 %v1415_v55, %v3342_v22  ;;  %v2532_v22 = vld [vmem:[#allocation7 + $0x1a0] sm:$0xf] }
 0x753   :  { %v2533_v44 = vor.u32 %v2816_v42, %v2532_v22  ;;  %v2468_v55 = vld [vmem:[#allocation7 + $0x120] sm:$0xf]  ;;  %v2453_v22 = vor.u32 %v2796_v32, %v2452_v30  ;;  %v2454_v42 = vld [vmem:[#allocation7 + $0x110] sm:$0xf0] }
 0x754   :  { %v1422_v11 = vmul.f32 %v3380_v8, %v3380_v8  ;;  %v2457_v35 = vor.u32 %v2794_v41, %v2454_v42 }
 0x755   :  { %1638 = vmatpush.bf16.msrb.mxu0 %v2533_v44  ;;  %v2797_v44 = vld [vmem:[#allocation7 + $0x114] sm:$0xf0] }
 0x756   :  { %1423 = vadd.xlane.f32.xlu1 %v1422_v11  ;;  %v2800_v11 = vld [vmem:[#allocation7 + $0x12c] sm:$0xf0]  ;;  %v2461_v45 = vor.u32 %v2797_v44, %v2460_v43 }
 0x757   :  { %v2469_v14 = vor.u32 %v2800_v11, %v2468_v55 }
 0x758   :  { %1669 = vmatpush.bf16.msrb.mxu2 %v2461_v45 }
 0x759   :  { %v1417_v12 = vpop.f32.mrf.mxu3  ;;  %1639 = vmatpush.bf16.msrb.mxu0 %v2517_v23 }
 0x75a   :  { %v2798_v12 = vld [vmem:[#allocation7 + $0x124] sm:$0xf] }
 0x75b   :  { %v2473_v20 = vor.u32 %v2798_v12, %v2470_v16 }
 0x75d   :  { %1640 = vmatpush.bf16.msrb.mxu0 %v2501_v3  ;;  %1655 = vmatpush.bf16.msrb.mxu1 %v2473_v20  ;;  %v2831_v3 = vld [vmem:[#allocation8 + $0xa8] sm:$0xff] }
 0x761   :  { %1641 = vmatpush.bf16.msrb.mxu0 %v2485_v1  ;;  %1656 = vmatpush.bf16.msrb.mxu1 %v2457_v35 }
 0x765   :  { %1642 = vmatpush.bf16.msrb.mxu0 %v2469_v14  ;;  %1846 = vmatpush.bf16.msra.mxu1 %v2841_v40  ;;  %v2846_v40 = vld [vmem:[#allocation11 + $0x20] sm:$0xff] }
 0x769   :  { %1643 = vmatpush.bf16.msrb.mxu0 %v2453_v22  ;;  %1847 = vmatpush.bf16.msra.mxu1 %v2840_v46  ;;  %v2849_v22 = vld [vmem:[#allocation11 + $0x38] sm:$0xff] }
 0x76a   :  { %1946 = vmatpush.bf16.msra.mxu2 %v2849_v22 }
 0x76d   :  { %1833 = vmatpush.bf16.msra.mxu0 %v2833_v54  ;;  %1848 = vmatpush.bf16.msra.mxu1 %v2839_v47  ;;  %v2847_v54 = vld [vmem:[#allocation11 + $0x28] sm:$0xff] }
 0x76e   :  { %1947 = vmatpush.bf16.msra.mxu2 %v2848_v53 }
 0x771   :  { %1834 = vmatpush.bf16.msra.mxu0 %v2832_v39  ;;  %1849 = vmatpush.bf16.msra.mxu1 %v2838_v51 }
 0x772   :  { %1948 = vmatpush.bf16.msra.mxu2 %v2847_v54 }
 0x775   :  { %1835 = vmatpush.bf16.msra.mxu0 %v2831_v3  ;;  %1850 = vmatpush.bf16.msra.mxu1 %v2837_v57 }
 0x776   :  { %1949 = vmatpush.bf16.msra.mxu2 %v2846_v40 }
 0x779   :  { %1836 = vmatpush.bf16.msra.mxu0 %v2830_v50  ;;  %1851 = vmatpush.bf16.msra.mxu1 %v2836_v59 }
 0x77d   :  { %1837 = vmatpush.bf16.msra.mxu0 %v2829_v52  ;;  %1852 = vmatpush.bf16.msra.mxu1 %v2835_v61 }
 0x781   :  { %1838 = vmatpush.bf16.msra.mxu0 %v2828_v58  ;;  %1853 = vmatpush.bf16.msra.mxu1 %v2834_v63 }
 0x785   :  { %1839 = vmatpush.bf16.msra.mxu0 %v2827_v60 }
 0x789   :  { %1840 = vmatpush.bf16.msra.mxu0 %v2826_v62 }
 0x7c9   :  { %v1424_v9 = vpop.xlane.xlu1 %1423 }
 0x7ca   :  { %v1425_v10 = vmul.f32 0.010416667, %v1424_v9  ;;  %v2845_v9 = vld [vmem:[#allocation11 + $0x18] sm:$0xff] }
 0x7cb   :  { %1950 = vmatpush.bf16.msra.mxu2 %v2845_v9 }
 0x7cc   :  { %v1426_v13 = vadd.f32 1e-05, %v1425_v10  ;;  %v2844_v10 = vld [vmem:[#allocation11 + $0x10] sm:$0xff] }
 0x7ce   :  { %2893 = vrsqrt.f32 %v1426_v13  ;;  %vm1433_vm12 = vweird.f32 %v1426_v13 }
 0x7cf   :  { %1951 = vmatpush.bf16.msra.mxu2 %v2844_v10 }
 0x7d4   :  { %v2894_v15 = vpop.eup %2893 }
 0x7d5   :  { %v1428_v23 = vmul.f32 %v2894_v15, %v1426_v13  ;;  %vm1434_vm11 = vweird.f32 %v2894_v15  ;;  %v2843_v13 = vld [vmem:[#allocation11 + $0x8] sm:$0xff] }
 0x7d6   :  { %vm1435_vm13 = vmor %vm1433_vm12, %vm1434_vm11  ;;  %1952 = vmatpush.bf16.msra.mxu2 %v2843_v13 }
 0x7d7   :  { %v1429_v25 = vmul.f32 %v2894_v15, %v1428_v23 }
 0x7d9   :  { %v1430_v27 = vmul.f32 0.5, %v1429_v25 }
 0x7db   :  { %v1431_v29 = vsub.f32 1.5, %v1430_v27 }
 0x7dd   :  { %v1432_v0 = vmul.f32 %v2894_v15, %v1431_v29 }
 0x7df   :  { %v1436_v33 = vsel %vm1435_vm13, %v2894_v15, %v1432_v0  ;;  %v2842_v15 = vld [vmem:[#allocation11] sm:$0xff] }
 0x7e0   :  { %v1437_v34 = vmul.f32 %v1436_v33, %v3380_v8  ;;  %1953 = vmatpush.bf16.msra.mxu2 %v2842_v15 }
 0x7e2   :  { %v1441_v36 = vmul.f32 %v2869_v31, %v1437_v34 }
 0x7e4   :  { %v1442_v38 = vpack.c.bf16 %v1441_v36, %v1441_v36  ;;  %v2870_v36 = vld [vmem:[%s3407_s12] ss:$0 sm:$0xff] }
 0x7e6   :  { %1644 = vmatmul.bf16.vlgmr.msrb.gmra.mxu0 %v1442_v38  ;;  %1657 = vmatmul.bf16.vlgmr.msrb.gmra.mxu1 %v1442_v38 }
 0x7e7   :  { %1670 = vmatmul.bf16.vlgmr.msrb.gmra.mxu2 %v1442_v38  ;;  %1683 = vmatmul.bf16.vlgmr.msrb.gmra.mxu3 %v1442_v38 }
 0x863   :  { %v1645_v1 = vpop.f32.mrf.mxu0  ;;  %v1658_v2 = vpop.f32.mrf.mxu1 }
 0x864   :  { %v1688_v17 = vsub.f32 0.0, %v1645_v1  ;;  %v1689_v49 = vsub.f32 0.0, %v1658_v2 }
 0x866   :  { %v1690_v4 = vmul.f32 1.442695, %v1688_v17  ;;  %v1692_v5 = vmul.f32 1.442695, %v1689_v49 }
 0x868   :  { %2895 = vpow2.f32 %v1690_v4 }
 0x869   :  { %2897 = vpow2.f32 %v1692_v5 }
 0x86a   :  { %v1671_v6 = vpop.f32.mrf.mxu2  ;;  %v1684_v7 = vpop.f32.mrf.mxu3 }
 0x86b   :  { %v1647_v56 = vpop.f32.mrf.mxu0  ;;  %v1660_v55 = vpop.f32.mrf.mxu1 }
 0x86e   :  { %v2896_v11 = vpop.eup %2895 }
 0x86f   :  { %v2898_v12 = vpop.eup %2897  ;;  %v1694_v14 = vadd.f32 1.0, %v2896_v11 }
 0x870   :  { %v1695_v16 = vadd.f32 1.0, %v2898_v12 }
 0x871   :  { %2899 = vrcp.f32 %v1694_v14 }
 0x872   :  { %2901 = vrcp.f32 %v1695_v16  ;;  %v1673_v18 = vpop.f32.mrf.mxu2  ;;  %v1686_v19 = vpop.f32.mrf.mxu3 }
 0x877   :  { %v2900_v20 = vpop.eup %2899 }
 0x878   :  { %v2902_v21 = vpop.eup %2901  ;;  %v1698_v24 = vmul.f32 %v2900_v20, %v1645_v1 }
 0x879   :  { %v1699_v26 = vmul.f32 %v2902_v21, %v1658_v2 }
 0x87a   :  { %v1700_v28 = vmul.f32 %v1698_v24, %v1671_v6 }
 0x87b   :  { %v1701_v30 = vmul.f32 %v1699_v26, %v1684_v7 }
 0x87c   :  { %v1702_v32 = vpack.c.bf16 %v1700_v28, %v1700_v28 }
 0x87d   :  { %v1703_v41 = vpack.c.bf16 %v1701_v30, %v1701_v30 }
 0x87e   :  { %1841 = vmatmul.bf16.vlgmr.msra.gmra.mxu0 %v1702_v32 }
 0x87f   :  { %1854 = vmatmul.bf16.vlgmr.msra.gmra.mxu1 %v1703_v41 }
 0x8fb   :  { %v1842_v42 = vpop.f32.mrf.mxu0 }
 0x8fc   :  { %v1855_v43 = vpop.f32.mrf.mxu1 }
 0x8fd   :  { %v1856_v44 = vadd.f32 %v1855_v43, %v1842_v42 }
 0x8ff   :  { %v1859_v35 = vadd.f32 %v1856_v44, %v3380_v8 }
 0x901   :  { %v1861_v45 = vmul.f32 %v1859_v35, %v1859_v35 }
 0x903   :  { %1862 = vadd.xlane.f32.xlu2 %v1861_v45  ;;  %v1844_v37 = vpop.f32.mrf.mxu0 }
 0x904   :  { %v1857_v48 = vpop.f32.mrf.mxu1 }
 0x976   :  { %v1863_v23 = vpop.xlane.xlu2 %1862 }
 0x977   :  { %v1864_v8 = vmul.f32 0.010416667, %v1863_v23 }
 0x979   :  { %v1865_v25 = vadd.f32 1e-05, %v1864_v8 }
 0x97b   :  { %2903 = vrsqrt.f32 %v1865_v25  ;;  %vm1872_vm15 = vweird.f32 %v1865_v25 }
 0x981   :  { %v2904_v27 = vpop.eup %2903 }
 0x982   :  { %v1867_v29 = vmul.f32 %v2904_v27, %v1865_v25  ;;  %vm1873_vm14 = vweird.f32 %v2904_v27 }
 0x983   :  { %vm1874_vm0 = vmor %vm1872_vm15, %vm1873_vm14 }
 0x984   :  { %v1868_v0 = vmul.f32 %v2904_v27, %v1867_v29 }
 0x986   :  { %v1869_v31 = vmul.f32 0.5, %v1868_v0 }
 0x988   :  { %v1870_v33 = vsub.f32 1.5, %v1869_v31 }
 0x98a   :  { %v1871_v34 = vmul.f32 %v2904_v27, %v1870_v33 }
 0x98c   :  { %v1875_v38 = vsel %vm1874_vm0, %v2904_v27, %v1871_v34 }
 0x98d   :  { %v1876_v39 = vmul.f32 %v1875_v38, %v1859_v35 }
 0x98f   :  { %v1880_v46 = vmul.f32 %v2870_v36, %v1876_v39 }
 0x991   :  { %v1881_v3 = vpack.c.bf16 %v1880_v46, %v1880_v46 }
 0x993   :  { %1954 = vmatmul.bf16.vlgmr.msra.gmra.mxu2 %v1881_v3 }
 0xa16   :  { %v1955_v47 = vpop.f32.mrf.mxu2 }
 0xa17   :  { %1959 = vst [vmem:[%s3409_s14] sm:$0xff] %v1955_v47 }
 0xa1e   :  { %v1957_v50 = vpop.f32.mrf.mxu2 }
 0xa1f   :  { %1964 = vsyncpa [#allocation4], 1 }
 0xa20   :  { %1965 = vsyncpa [#allocation6], 1 }
 0xa21   :  { %1966 = vsyncpa [#allocation9], 1 }
 0xa22   :  { %1967 = vsyncpa [#allocation12], 1 }

</bundles_post_ra>
